<compile_context>
chip_gen: v6e
topology: v6e:2x2x1
jax: 0.10.0
libtpu: 0.0.40
codegen_flags: <defaults>
</compile_context>

<pallas_src>
import jax
import jax.numpy as jnp
from jax.experimental import pallas as pl
from jax.experimental.pallas import tpu as pltpu

IN_FEATURES = 4096
H1 = 256
H2 = 128
LANE = 128


def classifier_kernel(x_ref, w1_ref, b1_ref, w2_ref, b2_ref, w3_ref, b3_ref,
                      o_ref):
    # fc1: bf16 operands on the MXU, f32 accumulation.
    h1 = jnp.dot(x_ref[...].astype(jnp.bfloat16), w1_ref[...],
                 preferred_element_type=jnp.float32) + b1_ref[...]
    h1 = jnp.maximum(h1, 0.0).astype(jnp.bfloat16)
    # fc2
    h2 = jnp.dot(h1, w2_ref[...], preferred_element_type=jnp.float32) + b2_ref[...]
    h2 = jnp.maximum(h2, 0.0).astype(jnp.bfloat16)
    # fc3 (class dim lane-padded to c_pad)
    logits = jnp.dot(h2, w3_ref[...], preferred_element_type=jnp.float32) + b3_ref[...]
    # Numerically stable log_softmax over dim=0 (the batch axis).
    m = jnp.max(logits, axis=0, keepdims=True)
    z = logits - m
    lse = jnp.log(jnp.sum(jnp.exp(z), axis=0, keepdims=True))
    o_ref[...] = z - lse


def classifier_forward(x, params, numclasses):
    w1, b1, w2, b2, w3p, b3p = params
    B, K = x.shape
    assert K == IN_FEATURES, f"expected K={IN_FEATURES}, got {K}"
    c_pad = w3p.shape[1]

    flops = 2 * B * (K * H1 + H1 * H2 + H2 * c_pad)
    bytes_accessed = (x.size * x.dtype.itemsize
                      + w1.size * 2 + w2.size * 2 + w3p.size * 2
                      + (b1.size + b2.size + b3p.size) * 4
                      + B * c_pad * 4)

    out = pl.pallas_call(
        classifier_kernel,
        out_shape=jax.ShapeDtypeStruct((B, c_pad), jnp.float32),
        grid_spec=pltpu.PrefetchScalarGridSpec(
            num_scalar_prefetch=0,
            grid=(1,),                                    # single step: no K tiling
            in_specs=[
                pl.BlockSpec((B, K), lambda k: (0, 0)),       # x (full, f32)
                pl.BlockSpec((K, H1), lambda k: (0, 0)),      # w1 (bf16, 2 MiB)
                pl.BlockSpec((1, H1), lambda k: (0, 0)),      # b1
                pl.BlockSpec((H1, H2), lambda k: (0, 0)),     # w2 (bf16)
                pl.BlockSpec((1, H2), lambda k: (0, 0)),      # b2
                pl.BlockSpec((H2, c_pad), lambda k: (0, 0)),  # w3 lane-padded (bf16)
                pl.BlockSpec((1, c_pad), lambda k: (0, 0)),   # b3 lane-padded
            ],
            out_specs=pl.BlockSpec((B, c_pad), lambda k: (0, 0)),
        ),
        compiler_params=pltpu.CompilerParams(
            dimension_semantics=("arbitrary",),
            vmem_limit_bytes=32 * 1024 * 1024,
        ),
        cost_estimate=pl.CostEstimate(
            flops=flops,
            transcendentals=B * c_pad + c_pad,   # exp + log
            bytes_accessed=bytes_accessed,
        ),
    )(x, w1, b1, w2, b2, w3p, b3p)
    return out[:, :numclasses]


def init_params(key, numclasses):
    # Deterministic init mimicking nn.Linear default: U(-1/sqrt(fan_in), +1/sqrt(fan_in))
    ks = jax.random.split(key, 6)

    def linear(kw, kb, fan_in, fan_out):
        bound = 1.0 / (fan_in ** 0.5)
        w = jax.random.uniform(kw, (fan_in, fan_out), jnp.float32, -bound, bound)
        b = jax.random.uniform(kb, (1, fan_out), jnp.float32, -bound, bound)
        return w, b

    w1, b1 = linear(ks[0], ks[1], IN_FEATURES, H1)
    w2, b2 = linear(ks[2], ks[3], H1, H2)
    w3, b3 = linear(ks[4], ks[5], H2, numclasses)

    # Lane-dense padding of the class dim (10 -> 128) with zero weights/bias.
    # log_softmax is over dim=0 (per-column), so padded columns never affect
    # real columns.
    c_pad = ((numclasses + LANE - 1) // LANE) * LANE
    w3p = jnp.zeros((H2, c_pad), jnp.float32).at[:, :numclasses].set(w3)
    b3p = jnp.zeros((1, c_pad), jnp.float32).at[:, :numclasses].set(b3)

    # Weights in bf16 (halves the dominant w1 HBM traffic); biases stay f32.
    f32_params = (w1, b1, w2, b2, w3p, b3p)
    bf16_params = (w1.astype(jnp.bfloat16), b1,
                   w2.astype(jnp.bfloat16), b2,
                   w3p.astype(jnp.bfloat16), b3p)
    return bf16_params, f32_params


def reference_forward_bf16(x, params, numclasses):
    # Pure-JAX reference using the same bf16-weight / f32-accumulate recipe.
    w1, b1, w2, b2, w3p, b3p = params
    h1 = jnp.dot(x.astype(jnp.bfloat16), w1, preferred_element_type=jnp.float32) + b1
    h1 = jnp.maximum(h1, 0.0)
    h2 = jnp.dot(h1.astype(jnp.bfloat16), w2, preferred_element_type=jnp.float32) + b2
    h2 = jnp.maximum(h2, 0.0)
    logits = jnp.dot(h2.astype(jnp.bfloat16), w3p, preferred_element_type=jnp.float32) + b3p
    return jax.nn.log_softmax(logits, axis=0)[:, :numclasses]


def reference_forward_f32(x, params, numclasses):
    # Full-f32 reference matching the original PyTorch module's numerics.
    w1, b1, w2, b2, w3p, b3p = params
    h1 = jnp.maximum(jnp.dot(x, w1) + b1, 0.0)
    h2 = jnp.maximum(jnp.dot(h1, w2) + b2, 0.0)
    logits = jnp.dot(h2, w3p) + b3p
    return jax.nn.log_softmax(logits, axis=0)[:, :numclasses]


if __name__ == "__main__":
    key = jax.random.PRNGKey(0)
    k_x, k_p = jax.random.split(key)

    B = 8
    numclasses = 10
    x = jax.random.normal(k_x, (B, IN_FEATURES), dtype=jnp.float32)
    params_bf16, params_f32 = init_params(k_p, numclasses)

    out = classifier_forward(x, params_bf16, numclasses)
    out = jax.block_until_ready(out)
    assert out.shape == (B, numclasses)

    # Tight check vs a bf16-matched JAX reference (same recipe as the kernel).
    ref_bf16 = reference_forward_bf16(x, params_bf16, numclasses)
    assert jnp.allclose(out, ref_bf16, atol=1e-3, rtol=1e-3), "mismatch vs bf16 JAX reference"

    # Looser parity check vs the full-f32 PyTorch-equivalent numerics.
    ref_f32 = reference_forward_f32(x, params_f32, numclasses)
    assert jnp.allclose(out, ref_f32, atol=5e-2, rtol=5e-2), "mismatch vs f32 reference"

    print("KERNEL_OK")
</pallas_src>

<mosaic_0001>
module attributes {stable_mosaic.version = 11 : i64} {
  func.func @classifier_kernel(%arg0: i32, %arg1: memref<8x4096xf32, #tpu.memory_space<vmem>>, %arg2: memref<4096x256xbf16, #tpu.memory_space<vmem>>, %arg3: memref<1x256xf32, #tpu.memory_space<vmem>>, %arg4: memref<256x128xbf16, #tpu.memory_space<vmem>>, %arg5: memref<1x128xf32, #tpu.memory_space<vmem>>, %arg6: memref<128x128xbf16, #tpu.memory_space<vmem>>, %arg7: memref<1x128xf32, #tpu.memory_space<vmem>>, %arg8: memref<8x128xf32, #tpu.memory_space<vmem>>) attributes {dimension_semantics = [#tpu.dimension_semantics<arbitrary>], iteration_bounds = array<i64: 1>, scalar_prefetch = 0 : i64, scratch_operands = 0 : i64, tpu.core_type = #tpu.core_type<tc>, window_params = [{pipeline_mode = #tpu.pipeline_mode<synchronous>, transform_indices = @transform_0, window_bounds = array<i64: 8, 4096>}, {pipeline_mode = #tpu.pipeline_mode<synchronous>, transform_indices = @transform_1, window_bounds = array<i64: 4096, 256>}, {pipeline_mode = #tpu.pipeline_mode<synchronous>, transform_indices = @transform_2, window_bounds = array<i64: 1, 256>}, {pipeline_mode = #tpu.pipeline_mode<synchronous>, transform_indices = @transform_3, window_bounds = array<i64: 256, 128>}, {pipeline_mode = #tpu.pipeline_mode<synchronous>, transform_indices = @transform_4, window_bounds = array<i64: 1, 128>}, {pipeline_mode = #tpu.pipeline_mode<synchronous>, transform_indices = @transform_5, window_bounds = array<i64: 128, 128>}, {pipeline_mode = #tpu.pipeline_mode<synchronous>, transform_indices = @transform_6, window_bounds = array<i64: 1, 128>}, {pipeline_mode = #tpu.pipeline_mode<synchronous>, transform_indices = @transform_7, window_bounds = array<i64: 8, 128>}]} {
    %c0 = arith.constant 0 : index
    %c0_0 = arith.constant 0 : index
    %0 = vector.load %arg1[%c0, %c0_0] : memref<8x4096xf32, #tpu.memory_space<vmem>>, vector<8x4096xf32>
    %1 = arith.truncf %0 : vector<8x4096xf32> to vector<8x4096xbf16>
    %c0_1 = arith.constant 0 : index
    %c0_2 = arith.constant 0 : index
    %2 = vector.load %arg2[%c0_1, %c0_2] : memref<4096x256xbf16, #tpu.memory_space<vmem>>, vector<4096x256xbf16>
    %cst = arith.constant dense<0.000000e+00> : vector<8x256xf32>
    %3 = tpu.matmul %1, %2, %cst {dimension_numbers = #tpu.dot_dimension_numbers<[1], [0], [0], [1], [0, 0, 1, 1], [], []>} : vector<8x4096xbf16>, vector<4096x256xbf16>, vector<8x256xf32> -> vector<8x256xf32>
    %c0_3 = arith.constant 0 : index
    %c0_4 = arith.constant 0 : index
    %4 = vector.load %arg3[%c0_3, %c0_4] : memref<1x256xf32, #tpu.memory_space<vmem>>, vector<1x256xf32>
    %5 = vector.broadcast %4 : vector<1x256xf32> to vector<8x256xf32>
    %6 = arith.addf %3, %5 : vector<8x256xf32>
    %cst_5 = arith.constant 0.000000e+00 : f32
    %7 = vector.broadcast %cst_5 : f32 to vector<8x256xf32>
    %8 = arith.maximumf %6, %7 : vector<8x256xf32>
    %9 = arith.truncf %8 : vector<8x256xf32> to vector<8x256xbf16>
    %c0_6 = arith.constant 0 : index
    %c0_7 = arith.constant 0 : index
    %10 = vector.load %arg4[%c0_6, %c0_7] : memref<256x128xbf16, #tpu.memory_space<vmem>>, vector<256x128xbf16>
    %cst_8 = arith.constant dense<0.000000e+00> : vector<8x128xf32>
    %11 = tpu.matmul %9, %10, %cst_8 {dimension_numbers = #tpu.dot_dimension_numbers<[1], [0], [0], [1], [0, 0, 1, 1], [], []>} : vector<8x256xbf16>, vector<256x128xbf16>, vector<8x128xf32> -> vector<8x128xf32>
    %c0_9 = arith.constant 0 : index
    %c0_10 = arith.constant 0 : index
    %12 = vector.load %arg5[%c0_9, %c0_10] : memref<1x128xf32, #tpu.memory_space<vmem>>, vector<1x128xf32>
    %13 = vector.broadcast %12 : vector<1x128xf32> to vector<8x128xf32>
    %14 = arith.addf %11, %13 : vector<8x128xf32>
    %cst_11 = arith.constant 0.000000e+00 : f32
    %15 = vector.broadcast %cst_11 : f32 to vector<8x128xf32>
    %16 = arith.maximumf %14, %15 : vector<8x128xf32>
    %17 = arith.truncf %16 : vector<8x128xf32> to vector<8x128xbf16>
    %c0_12 = arith.constant 0 : index
    %c0_13 = arith.constant 0 : index
    %18 = vector.load %arg6[%c0_12, %c0_13] : memref<128x128xbf16, #tpu.memory_space<vmem>>, vector<128x128xbf16>
    %cst_14 = arith.constant dense<0.000000e+00> : vector<8x128xf32>
    %19 = tpu.matmul %17, %18, %cst_14 {dimension_numbers = #tpu.dot_dimension_numbers<[1], [0], [0], [1], [0, 0, 1, 1], [], []>} : vector<8x128xbf16>, vector<128x128xbf16>, vector<8x128xf32> -> vector<8x128xf32>
    %c0_15 = arith.constant 0 : index
    %c0_16 = arith.constant 0 : index
    %20 = vector.load %arg7[%c0_15, %c0_16] : memref<1x128xf32, #tpu.memory_space<vmem>>, vector<1x128xf32>
    %21 = vector.broadcast %20 : vector<1x128xf32> to vector<8x128xf32>
    %22 = arith.addf %19, %21 : vector<8x128xf32>
    %cst_17 = arith.constant dense<0xFF800000> : vector<128xf32>
    %23 = vector.multi_reduction <maximumf>, %22, %cst_17 [0] : vector<8x128xf32> to vector<128xf32>
    %24 = vector.shape_cast %23 : vector<128xf32> to vector<1x128xf32>
    %25 = vector.broadcast %24 : vector<1x128xf32> to vector<8x128xf32>
    %26 = arith.subf %22, %25 : vector<8x128xf32>
    %27 = math.exp %26 : vector<8x128xf32>
    %cst_18 = arith.constant dense<0.000000e+00> : vector<128xf32>
    %28 = vector.multi_reduction <add>, %27, %cst_18 [0] : vector<8x128xf32> to vector<128xf32>
    %29 = vector.shape_cast %28 : vector<128xf32> to vector<1x128xf32>
    %30 = math.log %29 : vector<1x128xf32>
    %31 = vector.broadcast %30 : vector<1x128xf32> to vector<8x128xf32>
    %32 = arith.subf %26, %31 : vector<8x128xf32>
    %c0_19 = arith.constant 0 : index
    %c0_20 = arith.constant 0 : index
    %33 = vector.load %arg8[%c0_19, %c0_20] : memref<8x128xf32, #tpu.memory_space<vmem>>, vector<8x128xf32>
    tpu.vector_store %arg8[%c0_19, %c0_20], %32 {strides = array<i32>} : memref<8x128xf32, #tpu.memory_space<vmem>>, vector<8x128xf32>,
    return
  }
  func.func @transform_0(%arg0: i32) -> (i32, i32) {
    %c0_i32 = arith.constant 0 : i32
    %c0_i32_0 = arith.constant 0 : i32
    %c0_i32_1 = arith.constant 0 : i32
    return %c0_i32, %c0_i32_0 : i32, i32
  }
  func.func @transform_1(%arg0: i32) -> (i32, i32) {
    %c0_i32 = arith.constant 0 : i32
    %c0_i32_0 = arith.constant 0 : i32
    %c0_i32_1 = arith.constant 0 : i32
    return %c0_i32, %c0_i32_0 : i32, i32
  }
  func.func @transform_2(%arg0: i32) -> (i32, i32) {
    %c0_i32 = arith.constant 0 : i32
    %c0_i32_0 = arith.constant 0 : i32
    %c0_i32_1 = arith.constant 0 : i32
    return %c0_i32, %c0_i32_0 : i32, i32
  }
  func.func @transform_3(%arg0: i32) -> (i32, i32) {
    %c0_i32 = arith.constant 0 : i32
    %c0_i32_0 = arith.constant 0 : i32
    %c0_i32_1 = arith.constant 0 : i32
    return %c0_i32, %c0_i32_0 : i32, i32
  }
  func.func @transform_4(%arg0: i32) -> (i32, i32) {
    %c0_i32 = arith.constant 0 : i32
    %c0_i32_0 = arith.constant 0 : i32
    %c0_i32_1 = arith.constant 0 : i32
    return %c0_i32, %c0_i32_0 : i32, i32
  }
  func.func @transform_5(%arg0: i32) -> (i32, i32) {
    %c0_i32 = arith.constant 0 : i32
    %c0_i32_0 = arith.constant 0 : i32
    %c0_i32_1 = arith.constant 0 : i32
    return %c0_i32, %c0_i32_0 : i32, i32
  }
  func.func @transform_6(%arg0: i32) -> (i32, i32) {
    %c0_i32 = arith.constant 0 : i32
    %c0_i32_0 = arith.constant 0 : i32
    %c0_i32_1 = arith.constant 0 : i32
    return %c0_i32, %c0_i32_0 : i32, i32
  }
  func.func @transform_7(%arg0: i32) -> (i32, i32) {
    %c0_i32 = arith.constant 0 : i32
    %c0_i32_0 = arith.constant 0 : i32
    %c0_i32_1 = arith.constant 0 : i32
    return %c0_i32, %c0_i32_0 : i32, i32
  }
}

</mosaic_0001>

<bundles_post_ra>
// kernel: tpu_custom_call.1
= control target key start
LH: loop header
LB: loop body
LE: loop exit
PB: predicated region body
PF: predicated region fallthrough
CT: control target
= control target key end

     0   :  { %12 = vsyncpa [#allocation3], 0  ;;  %s5919_s0 = inlined_call_operand.hbm [shape: f32[8,4096], index: 0, kind: input, shape index: {}]   ;;  %s5920_s1 = inlined_call_operand.hbm [shape: bf16[4096,256], index: 1, kind: input, shape index: {}]   ;;  %s5921_s2 = inlined_call_operand.hbm [shape: f32[1,256], index: 2, kind: input, shape index: {}]   ;;  %s5922_s3 = inlined_call_operand.hbm [shape: bf16[256,128], index: 3, kind: input, shape index: {}]   ;;  %s5923_s4 = inlined_call_operand.hbm [shape: f32[1,128], index: 4, kind: input, shape index: {}]   ;;  %s5924_s5 = inlined_call_operand.hbm [shape: bf16[128,128], index: 5, kind: input, shape index: {}]   ;;  %s5925_s6 = inlined_call_operand.hbm [shape: f32[1,128], index: 6, kind: input, shape index: {}]   ;;  %s5926_s7 = inlined_call_operand.hbm [shape: f32[8,128], index: 7, kind: output, shape index: {}]  }
   0x1   :  { %13 = vsyncpa [#allocation6], 0 }
   0x2   :  { %14 = vsyncpa [#allocation9], 0 }
   0x3   :  { %15 = vsyncpa [#allocation12], 0 }
   0x4   :  { %16 = vsyncpa [#allocation4], 0  ;;  %s5817_s24 = smov [#allocation5]  }
   0x5   :  { %s32_s25 = sshll.u32 %s5817_s24, 4  ;;  %s33_s25 = int_to_ptr.vmem [resolvable:$true] %s32_s25 }
   0x6   :  { %s5655_s26 = scalar_lea.vmem %s33_s25, 65536  ;;  %p5660_p1 = scmp.lt.s32.totalorder %s33_s25, %s33_s25 }
   0x7   :  { %p5656_p0 = scmp.ne.s32.totalorder %s33_s25, %s5655_s26  ;;  %p5661_p2 = scmp.lt.s32.totalorder %s5655_s26, %s5655_s26 }
   0x9   :  { %p5662_p3 = por %p5661_p2, %p5660_p1 }
   0xb   :  { %p5663_p4 = pnand %p5662_p3, %p5656_p0 }
   0xd   :  { %5666 = shalt.err (!%p5663_p4)
}
   0xe   :  { %s5818_s27 = smov 128   ;;  %s5819_s28 = smov 8  }
   0xf   :  { %38 = dma.hbm_to_vmem [thread:$0]  %s5920_s1, 65536, %s33_s25, [#allocation6], %s5818_s27, %s5818_s27, %s5819_s28  }
  0x10   :  { %s5820_s8 = smov [#allocation8]  }
  0x11   :  { %s54_s9 = sshll.u32 %s5820_s8, 4  ;;  %s55_s9 = int_to_ptr.vmem [resolvable:$true] %s54_s9 }
  0x12   :  { %s5675_s10 = scalar_lea.vmem %s55_s9, 2048  ;;  %p5680_p6 = scmp.lt.s32.totalorder %s55_s9, %s55_s9 }
  0x13   :  { %p5676_p5 = scmp.ne.s32.totalorder %s55_s9, %s5675_s10  ;;  %p5681_p7 = scmp.lt.s32.totalorder %s5675_s10, %s5675_s10 }
  0x15   :  { %p5682_p8 = por %p5681_p7, %p5680_p6 }
  0x17   :  { %p5683_p9 = pnand %p5682_p8, %p5676_p5 }
  0x19   :  { %5686 = shalt.err (!%p5683_p9)
}
  0x1a   :  { %s5821_s11 = smov 64   ;;  %s5822_s12 = smov 4  }
  0x1b   :  { %60 = dma.hbm_to_vmem [thread:$0]  %s5922_s3, 2048, %s55_s9, [#allocation9], %s5821_s11, %s5821_s11, %s5822_s12  }
  0x1c   :  { %s5823_s15 = smov [#allocation11]   ;;  %s5824_s17 = smov [#allocation2]  }
  0x1d   :  { %s76_s16 = sshll.u32 %s5823_s15, 4  ;;  %s23_s1 = sshll.u32 %s5824_s17, 4  ;;  %s77_s16 = int_to_ptr.vmem [resolvable:$true] %s76_s16  ;;  %s24_s1 = int_to_ptr.vmem [resolvable:$true] %s23_s1 }
  0x1e   :  { %s5695_s18 = scalar_lea.vmem %s77_s16, 1024  ;;  %p5700_p11 = scmp.lt.s32.totalorder %s77_s16, %s77_s16 }
  0x1f   :  { %p5696_p10 = scmp.ne.s32.totalorder %s77_s16, %s5695_s18  ;;  %p5701_p12 = scmp.lt.s32.totalorder %s5695_s18, %s5695_s18 }
  0x21   :  { %p5702_p13 = por %p5701_p12, %p5700_p11 }
  0x23   :  { %p5703_p0 = pnand %p5702_p13, %p5696_p10 }
  0x25   :  { %5706 = shalt.err (!%p5703_p0)
}
  0x26   :  { %82 = dma.hbm_to_vmem [thread:$0]  %s5924_s5, 1024, %s77_s16, [#allocation12], %s5821_s11, %s5821_s11, %s5822_s12  }
  0x27   :  { %s5715_s21 = scalar_lea.vmem %s24_s1, 4096  ;;  %p5720_p2 = scmp.lt.s32.totalorder %s24_s1, %s24_s1 }
  0x28   :  { %p5716_p1 = scmp.ne.s32.totalorder %s24_s1, %s5715_s21  ;;  %p5721_p3 = scmp.lt.s32.totalorder %s5715_s21, %s5715_s21 }
  0x2a   :  { %p5722_p4 = por %p5721_p3, %p5720_p2 }
  0x2c   :  { %p5723_p5 = pnand %p5722_p4, %p5716_p1 }
  0x2e   :  { %5726 = shalt.err (!%p5723_p5)
}
  0x2f   :  { %26 = dma.hbm_to_vmem [thread:$0]  %s5919_s0, 4096, %s24_s1, [#allocation3]  }
  0x30   :  { %s5825_s23 = smov [#allocation7]   ;;  %s5826_s25 = smov [#allocation10]  }
  0x31   :  { %s45_s24 = sshll.u32 %s5825_s23, 4  ;;  %s67_s26 = sshll.u32 %s5826_s25, 4  ;;  %s46_s24 = int_to_ptr.vmem [resolvable:$true] %s45_s24  ;;  %s68_s26 = int_to_ptr.vmem [resolvable:$true] %s67_s26 }
  0x32   :  { %s5735_s27 = scalar_lea.vmem %s46_s24, 32  ;;  %p5740_p7 = scmp.lt.s32.totalorder %s46_s24, %s46_s24 }
  0x33   :  { %p5736_p6 = scmp.ne.s32.totalorder %s46_s24, %s5735_s27  ;;  %p5741_p8 = scmp.lt.s32.totalorder %s5735_s27, %s5735_s27 }
  0x35   :  { %p5742_p9 = por %p5741_p8, %p5740_p7 }
  0x37   :  { %p5743_p10 = pnand %p5742_p9, %p5736_p6 }
  0x39   :  { %5746 = shalt.err (!%p5743_p10)
}
  0x3a   :  { %48 = dma.hbm_to_vmem [thread:$0]  %s5921_s2, 32, %s46_s24, [#allocation6]  }
  0x3b   :  { %s5755_s29 = scalar_lea.vmem %s68_s26, 16  ;;  %s5759_s0 = scalar_lea.vmem %s68_s26, 32 }
  0x3c   :  { %p5756_p11 = scmp.ne.s32.totalorder %s68_s26, %s5755_s29  ;;  %p5760_p12 = scmp.lt.s32.totalorder %s68_s26, %s68_s26 }
  0x3d   :  { %p5761_p13 = scmp.lt.s32.totalorder %s5759_s0, %s5755_s29 }
  0x3f   :  { %p5762_p0 = por %p5761_p13, %p5760_p12 }
  0x41   :  { %p5763_p1 = pnand %p5762_p0, %p5756_p11 }
  0x43   :  { %5766 = shalt.err (!%p5763_p1)
}
  0x44   :  { %70 = dma.hbm_to_vmem [thread:$0]  %s5923_s4, 16, %s68_s26, [#allocation9]  }
  0x45   :  { %s5827_s9 = smov [#allocation13]  }
  0x46   :  { %s89_s10 = sshll.u32 %s5827_s9, 4  ;;  %s90_s10 = int_to_ptr.vmem [resolvable:$true] %s89_s10 }
  0x47   :  { %s5775_s11 = scalar_lea.vmem %s90_s10, 16  ;;  %s5779_s12 = scalar_lea.vmem %s90_s10, 32 }
  0x48   :  { %p5776_p2 = scmp.ne.s32.totalorder %s90_s10, %s5775_s11  ;;  %p5780_p3 = scmp.lt.s32.totalorder %s90_s10, %s90_s10 }
  0x49   :  { %p5781_p4 = scmp.lt.s32.totalorder %s5779_s12, %s5775_s11 }
  0x4b   :  { %p5782_p5 = por %p5781_p4, %p5780_p3 }
  0x4d   :  { %p5783_p6 = pnand %p5782_p5, %p5776_p2 }
  0x4f   :  { %5786 = shalt.err (!%p5783_p6)
}
  0x50   :  { %92 = dma.hbm_to_vmem [thread:$0]  %s5925_s6, 16, %s90_s10, [#allocation12]  }
  0x51   :  { %5807 = dma.done.wait [#allocation3], 4096  }
  0x52   :  { %5808 = vsyncadd [#allocation3], 4294963200 }
  0x53   :  { %5809 = dma.done.wait [#allocation6], 65568  }
  0x54   :  { %5810 = vsyncadd [#allocation6], 4294901728 }
  0x55   :  { %5811 = dma.done.wait [#allocation9], 2064  }
  0x56   :  { %5812 = vsyncadd [#allocation9], 4294965232 }
  0x57   :  { %5813 = dma.done.wait [#allocation12], 1040  }
  0x58   :  { %5814 = vsyncadd [#allocation12], 4294966256  ;;  %v4851_v0 = vld [vmem:[#allocation5 + $0x74] ss:$8 sps:$4 sm:$0xff]   ;;  %v4855_v2 = vld [vmem:[#allocation5 + $0x70] ss:$8 sps:$4 sm:$0xff]  }
  0x59   :  { %v4853_v1 = vld [vmem:[#allocation5 + $0x174] ss:$8 sps:$4 sm:$0xff]   ;;  %3263 = vmatprep.subr.bf16.mxu0 %v4851_v0  ;;  %v4856_v3 = vld [vmem:[#allocation5 + $0x170] ss:$8 sps:$4 sm:$0xff]   ;;  %v4857_v4 = vld [vmem:[#allocation5 + $0x64] ss:$8 sps:$4 sm:$0xff]  }
  0x5a   :  { %3304 = vmatprep.subr.bf16.mxu1 %v4853_v1  ;;  %3264 = vmatpush1.bf16.msra.mxu0 %v4855_v2  ;;  %v4859_v5 = vld [vmem:[#allocation5 + $0x164] ss:$8 sps:$4 sm:$0xff]   ;;  %v4861_v6 = vld [vmem:[#allocation5 + $0x60] ss:$8 sps:$4 sm:$0xff]   ;;  %v4863_v8 = vld [vmem:[#allocation5 + $0x54] ss:$8 sps:$4 sm:$0xff]  }
  0x5b   :  { %3305 = vmatpush1.bf16.msra.mxu1 %v4856_v3  ;;  %3265 = vmatprep.subr.bf16.mxu0 %v4857_v4  ;;  %v4862_v7 = vld [vmem:[#allocation5 + $0x160] ss:$8 sps:$4 sm:$0xff]   ;;  %v4865_v9 = vld [vmem:[#allocation5 + $0x154] ss:$8 sps:$4 sm:$0xff]   ;;  %v4867_v10 = vld [vmem:[#allocation5 + $0x50] ss:$8 sps:$4 sm:$0xff]  }
  0x5c   :  { %3306 = vmatprep.subr.bf16.mxu1 %v4859_v5  ;;  %v4868_v11 = vld [vmem:[#allocation5 + $0x150] ss:$8 sps:$4 sm:$0xff]   ;;  %v4869_v12 = vld [vmem:[#allocation5 + $0x44] ss:$8 sps:$4 sm:$0xff]   ;;  %v4873_v14 = vld [vmem:[#allocation5 + $0x40] ss:$8 sps:$4 sm:$0xff]  }
  0x5d   :  { %v4871_v13 = vld [vmem:[#allocation5 + $0x144] ss:$8 sps:$4 sm:$0xff]   ;;  %v4874_v15 = vld [vmem:[#allocation5 + $0x140] ss:$8 sps:$4 sm:$0xff]   ;;  %v4875_v16 = vld [vmem:[#allocation5 + $0x34] ss:$8 sps:$4 sm:$0xff]  }
  0x5e   :  { %3266 = vmatpush1.bf16.msra.mxu0 %v4861_v6  ;;  %v4877_v17 = vld [vmem:[#allocation5 + $0x134] ss:$8 sps:$4 sm:$0xff]   ;;  %v4879_v18 = vld [vmem:[#allocation5 + $0x30] ss:$8 sps:$4 sm:$0xff]   ;;  %v4881_v20 = vld [vmem:[#allocation5 + $0x24] ss:$8 sps:$4 sm:$0xff]  }
  0x5f   :  { %3307 = vmatpush1.bf16.msra.mxu1 %v4862_v7  ;;  %3267 = vmatprep.subr.bf16.mxu0 %v4863_v8  ;;  %v4880_v19 = vld [vmem:[#allocation5 + $0x130] ss:$8 sps:$4 sm:$0xff]   ;;  %v4883_v21 = vld [vmem:[#allocation5 + $0x124] ss:$8 sps:$4 sm:$0xff]   ;;  %v4885_v22 = vld [vmem:[#allocation5 + $0x20] ss:$8 sps:$4 sm:$0xff]  }
  0x60   :  { %3308 = vmatprep.subr.bf16.mxu1 %v4865_v9  ;;  %v4886_v23 = vld [vmem:[#allocation5 + $0x120] ss:$8 sps:$4 sm:$0xff]   ;;  %v4887_v24 = vld [vmem:[#allocation5 + $0x14] ss:$8 sps:$4 sm:$0xff]   ;;  %v4891_v26 = vld [vmem:[#allocation5 + $0x10] ss:$8 sps:$4 sm:$0xff]  }
  0x61   :  { %v4889_v25 = vld [vmem:[#allocation5 + $0x114] ss:$8 sps:$4 sm:$0xff]   ;;  %v4892_v27 = vld [vmem:[#allocation5 + $0x110] ss:$8 sps:$4 sm:$0xff]   ;;  %v4893_v28 = vld [vmem:[#allocation5 + $0x4] ss:$8 sps:$4 sm:$0xff]  }
  0x62   :  { %3268 = vmatpush1.bf16.msra.mxu0 %v4867_v10  ;;  %v4895_v29 = vld [vmem:[#allocation5 + $0x104] ss:$8 sps:$4 sm:$0xff]   ;;  %v4897_v30 = vld [vmem:[#allocation5] ss:$8 sps:$4 sm:$0xff]   ;;  %v4899_v32 = vld [vmem:[#allocation5 + $0xf4] ss:$8 sps:$4 sm:$0xff]  }
  0x63   :  { %3309 = vmatpush1.bf16.msra.mxu1 %v4868_v11  ;;  %3269 = vmatprep.subr.bf16.mxu0 %v4869_v12  ;;  %v4898_v31 = vld [vmem:[#allocation5 + $0x100] ss:$8 sps:$4 sm:$0xff]   ;;  %v4901_v33 = vld [vmem:[#allocation5 + $0x1f4] ss:$8 sps:$4 sm:$0xff]   ;;  %v4903_v34 = vld [vmem:[#allocation5 + $0xf0] ss:$8 sps:$4 sm:$0xff]  }
  0x64   :  { %3310 = vmatprep.subr.bf16.mxu1 %v4871_v13  ;;  %v4904_v35 = vld [vmem:[#allocation5 + $0x1f0] ss:$8 sps:$4 sm:$0xff]   ;;  %v4905_v36 = vld [vmem:[#allocation5 + $0xe4] ss:$8 sps:$4 sm:$0xff]   ;;  %v4909_v38 = vld [vmem:[#allocation5 + $0xe0] ss:$8 sps:$4 sm:$0xff]  }
  0x65   :  { %v4907_v37 = vld [vmem:[#allocation5 + $0x1e4] ss:$8 sps:$4 sm:$0xff]   ;;  %v4910_v39 = vld [vmem:[#allocation5 + $0x1e0] ss:$8 sps:$4 sm:$0xff]   ;;  %v4911_v40 = vld [vmem:[#allocation5 + $0xd4] ss:$8 sps:$4 sm:$0xff]  }
  0x66   :  { %3270 = vmatpush1.bf16.msra.mxu0 %v4873_v14  ;;  %v4913_v41 = vld [vmem:[#allocation5 + $0x1d4] ss:$8 sps:$4 sm:$0xff]   ;;  %v4915_v42 = vld [vmem:[#allocation5 + $0xd0] ss:$8 sps:$4 sm:$0xff]   ;;  %v4917_v44 = vld [vmem:[#allocation5 + $0xc4] ss:$8 sps:$4 sm:$0xff]  }
  0x67   :  { %3311 = vmatpush1.bf16.msra.mxu1 %v4874_v15  ;;  %3271 = vmatprep.subr.bf16.mxu0 %v4875_v16  ;;  %v4916_v43 = vld [vmem:[#allocation5 + $0x1d0] ss:$8 sps:$4 sm:$0xff]   ;;  %v4919_v45 = vld [vmem:[#allocation5 + $0x1c4] ss:$8 sps:$4 sm:$0xff]   ;;  %v4921_v47 = vld [vmem:[#allocation5 + $0xc0] ss:$8 sps:$4 sm:$0xff]  }
  0x68   :  { %3312 = vmatprep.subr.bf16.mxu1 %v4877_v17  ;;  %v116_v46 = vld [vmem:[#allocation2 + $0x8] sm:$0xff]  ;;  %v118_v50 = vld [vmem:[#allocation2 + $0x18] sm:$0xff]  ;;  %v115_v4 = vld [vmem:[#allocation2] sm:$0xff]  ;;  %vm5829_vm0 = vmmov 0   ;;  %s5830_s4 = smov [#allocation14]  }
  0x69   :  { %v4922_v48 = vld [vmem:[#allocation5 + $0x1c0] ss:$8 sps:$4 sm:$0xff]   ;;  %v148_v49 = vpack.c.bf16 %v116_v46, %v116_v46  ;;  %v4923_v51 = vld [vmem:[#allocation5 + $0xb4] ss:$8 sps:$4 sm:$0xff]   ;;  %v150_v52 = vpack.c.bf16 %v118_v50, %v118_v50  ;;  %v4927_v54 = vld [vmem:[#allocation5 + $0xb0] ss:$8 sps:$4 sm:$0xff]   ;;  %v147_v8 = vpack.c.bf16 %v115_v4, %v115_v4 }
  0x6a   :  { %3272 = vmatpush1.bf16.msra.mxu0 %v4879_v18  ;;  %v4925_v53 = vld [vmem:[#allocation5 + $0x1b4] ss:$8 sps:$4 sm:$0xff]   ;;  %v4928_v55 = vld [vmem:[#allocation5 + $0x1b0] ss:$8 sps:$4 sm:$0xff]   ;;  %v4929_v56 = vld [vmem:[#allocation5 + $0xa4] ss:$8 sps:$4 sm:$0xff]  }
  0x6b   :  { %3313 = vmatpush1.bf16.msra.mxu1 %v4880_v19  ;;  %3273 = vmatprep.subr.bf16.mxu0 %v4881_v20  ;;  %v4931_v57 = vld [vmem:[#allocation5 + $0x1a4] ss:$8 sps:$4 sm:$0xff]   ;;  %v4933_v58 = vld [vmem:[#allocation5 + $0xa0] ss:$8 sps:$4 sm:$0xff]   ;;  %v4935_v60 = vld [vmem:[#allocation5 + $0x94] ss:$8 sps:$4 sm:$0xff]  }
  0x6c   :  { %3314 = vmatprep.subr.bf16.mxu1 %v4883_v21  ;;  %3295 = vmatprep.mubr.bf16.mxu0 %v148_v49  ;;  %v4934_v59 = vld [vmem:[#allocation5 + $0x1a0] ss:$8 sps:$4 sm:$0xff]   ;;  %v4937_v61 = vld [vmem:[#allocation5 + $0x194] ss:$8 sps:$4 sm:$0xff]   ;;  %v4939_v62 = vld [vmem:[#allocation5 + $0x90] ss:$8 sps:$4 sm:$0xff]  }
  0x6d   :  { %3336 = vmatprep.mubr.bf16.mxu1 %v150_v52  ;;  %v4940_v63 = vld [vmem:[#allocation5 + $0x190] ss:$8 sps:$4 sm:$0xff]   ;;  %v4941_v0 = vld [vmem:[#allocation5 + $0x84] ss:$8 sps:$4 sm:$0xff]   ;;  %v4945_v2 = vld [vmem:[#allocation5 + $0x80] ss:$8 sps:$4 sm:$0xff]  }
  0x6e   :  { %3274 = vmatpush1.bf16.msra.mxu0 %v4885_v22  ;;  %v4943_v1 = vld [vmem:[#allocation5 + $0x184] ss:$8 sps:$4 sm:$0xff]   ;;  %v4946_v3 = vld [vmem:[#allocation5 + $0x180] ss:$8 sps:$4 sm:$0xff]   ;;  %v117_v5 = vld [vmem:[#allocation2 + $0x10] sm:$0xff]  ;;  %s4236_s6 = sshll.u32 %s5830_s4, 4  ;;  %s4237_s6 = int_to_ptr.vmem [resolvable:$true] %s4236_s6 }
  0x6f   :  { %3315 = vmatpush1.bf16.msra.mxu1 %v4886_v23  ;;  %3275 = vmatprep.subr.bf16.mxu0 %v4887_v24  ;;  %v4949_v6 = vld [vmem:[#allocation5 + $0x274] ss:$8 sps:$4 sm:$0xff]   ;;  %v149_v9 = vpack.c.bf16 %v117_v5, %v117_v5  ;;  %v4947_v10 = vld [vmem:[#allocation5 + $0x270] ss:$8 sps:$4 sm:$0xff]   ;;  %v4955_v12 = vld [vmem:[#allocation5 + $0x264] ss:$8 sps:$4 sm:$0xff]   ;;  %p5792_p8 = scmp.lt.s32.totalorder %s4237_s6, %s4237_s6 }
  0x70   :  { %3316 = vmatprep.subr.bf16.mxu1 %v4889_v25  ;;  %v4952_v7 = vld [vmem:[#allocation5 + $0x374] ss:$8 sps:$4 sm:$0xff]   ;;  %v4950_v11 = vld [vmem:[#allocation5 + $0x370] ss:$8 sps:$4 sm:$0xff]   ;;  %v4958_v13 = vld [vmem:[#allocation5 + $0x364] ss:$8 sps:$4 sm:$0xff]  }
  0x71   :  { %v4953_v14 = vld [vmem:[#allocation5 + $0x260] ss:$8 sps:$4 sm:$0xff]   ;;  %v4961_v16 = vld [vmem:[#allocation5 + $0x254] ss:$8 sps:$4 sm:$0xff]   ;;  %v4959_v18 = vld [vmem:[#allocation5 + $0x250] ss:$8 sps:$4 sm:$0xff]  }
  0x72   :  { %3276 = vmatpush1.bf16.msra.mxu0 %v4891_v26  ;;  %v4956_v15 = vld [vmem:[#allocation5 + $0x360] ss:$8 sps:$4 sm:$0xff]   ;;  %v4964_v17 = vld [vmem:[#allocation5 + $0x354] ss:$8 sps:$4 sm:$0xff]   ;;  %v4962_v19 = vld [vmem:[#allocation5 + $0x350] ss:$8 sps:$4 sm:$0xff]  }
  0x73   :  { %3317 = vmatpush1.bf16.msra.mxu1 %v4892_v27  ;;  %3277 = vmatprep.subr.bf16.mxu0 %v4893_v28  ;;  %v4967_v20 = vld [vmem:[#allocation5 + $0x244] ss:$8 sps:$4 sm:$0xff]   ;;  %v4965_v22 = vld [vmem:[#allocation5 + $0x240] ss:$8 sps:$4 sm:$0xff]   ;;  %v4973_v24 = vld [vmem:[#allocation5 + $0x234] ss:$8 sps:$4 sm:$0xff]  }
  0x74   :  { %3318 = vmatprep.subr.bf16.mxu1 %v4895_v29  ;;  %v4970_v21 = vld [vmem:[#allocation5 + $0x344] ss:$8 sps:$4 sm:$0xff]   ;;  %v4968_v23 = vld [vmem:[#allocation5 + $0x340] ss:$8 sps:$4 sm:$0xff]   ;;  %v4976_v25 = vld [vmem:[#allocation5 + $0x334] ss:$8 sps:$4 sm:$0xff]  }
  0x75   :  { %v4971_v26 = vld [vmem:[#allocation5 + $0x230] ss:$8 sps:$4 sm:$0xff]   ;;  %v4979_v28 = vld [vmem:[#allocation5 + $0x224] ss:$8 sps:$4 sm:$0xff]   ;;  %v5001_v50 = vld [vmem:[#allocation5 + $0x2e0] ss:$8 sps:$4 sm:$0xff]  }
  0x76   :  { %3278 = vmatpush1.bf16.msra.mxu0 %v4897_v30  ;;  %v4974_v27 = vld [vmem:[#allocation5 + $0x330] ss:$8 sps:$4 sm:$0xff]   ;;  %v4982_v29 = vld [vmem:[#allocation5 + $0x324] ss:$8 sps:$4 sm:$0xff]   ;;  %v4977_v30 = vld [vmem:[#allocation5 + $0x220] ss:$8 sps:$4 sm:$0xff]  }
  0x77   :  { %3319 = vmatpush1.bf16.msra.mxu1 %v4898_v31  ;;  %3279 = vmatprep.subr.bf16.mxu0 %v4899_v32  ;;  %v4980_v31 = vld [vmem:[#allocation5 + $0x320] ss:$8 sps:$4 sm:$0xff]   ;;  %v4985_v32 = vld [vmem:[#allocation5 + $0x214] ss:$8 sps:$4 sm:$0xff]   ;;  %v4995_v46 = vld [vmem:[#allocation5 + $0x2f0] ss:$8 sps:$4 sm:$0xff]  }
  0x78   :  { %3320 = vmatprep.subr.bf16.mxu1 %v4901_v33  ;;  %v4988_v33 = vld [vmem:[#allocation5 + $0x314] ss:$8 sps:$4 sm:$0xff]   ;;  %v5006_v49 = vld [vmem:[#allocation5 + $0x3e4] ss:$8 sps:$4 sm:$0xff]   ;;  %s5787_s14 = scalar_lea.vmem %s4237_s6, 128 }
  0x79   :  { %v5009_v52 = vld [vmem:[#allocation5 + $0x2d4] ss:$8 sps:$4 sm:$0xff]   ;;  %p5788_p7 = scmp.ne.s32.totalorder %s4237_s6, %s5787_s14  ;;  %p5793_p9 = scmp.lt.s32.totalorder %s5787_s14, %s5787_s14 }
  0x7a   :  { %3280 = vmatpush2.bf16.msra.mxu0 %v4903_v34  ;;  %v120_v34 = vld [vmem:[#allocation2 + $0x28] sm:$0xff]  ;;  %v5033_v4 = vld [vmem:[#allocation5 + $0x294] ss:$8 sps:$4 sm:$0xff]  }
  0x7b   :  { %3321 = vmatpush2.bf16.msra.mxu1 %v4904_v35  ;;  %3281 = vmatprep.subr.bf16.mxu0 %v4905_v36  ;;  %v4983_v35 = vld [vmem:[#allocation5 + $0x210] ss:$8 sps:$4 sm:$0xff]   ;;  %v5036_v5 = vld [vmem:[#allocation5 + $0x394] ss:$8 sps:$4 sm:$0xff]   ;;  %p5794_p10 = por %p5793_p9, %p5792_p8 }
  0x7c   :  { %3322 = vmatprep.subr.bf16.mxu1 %v4907_v37  ;;  %v4986_v36 = vld [vmem:[#allocation5 + $0x310] ss:$8 sps:$4 sm:$0xff]   ;;  %v152_v37 = vpack.c.bf16 %v120_v34, %v120_v34  ;;  %v5061_v34 = vld [vmem:[#allocation5 + $0x440] ss:$8 sps:$4 sm:$0xff]  }
  0x7d   :  { %p5795_p11 = pnand %p5794_p10, %p5788_p7 }
  0x7e   :  { %3282 = vmatpush2.bf16.msra.mxu0 %v4909_v38  ;;  %v122_v38 = vld [vmem:[#allocation2 + $0x38] sm:$0xff] }
  0x7f   :  { %3323 = vmatpush2.bf16.msra.mxu1 %v4910_v39  ;;  %3283 = vmatprep.subr.bf16.mxu0 %v4911_v40  ;;  %v4991_v39 = vld [vmem:[#allocation5 + $0x204] ss:$8 sps:$4 sm:$0xff]   ;;  %v154_v40 = vpack.c.bf16 %v122_v38, %v122_v38  ;;  %v5067_v38 = vld [vmem:[#allocation5 + $0x430] ss:$8 sps:$4 sm:$0xff]  }
  0x80   :  { %3324 = vmatprep.subr.bf16.mxu1 %v4913_v41  ;;  %v4994_v41 = vld [vmem:[#allocation5 + $0x304] ss:$8 sps:$4 sm:$0xff]  }
  0x82   :  { %3284 = vmatpush2.bf16.msra.mxu0 %v4915_v42  ;;  %v4989_v42 = vld [vmem:[#allocation5 + $0x200] ss:$8 sps:$4 sm:$0xff]  }
  0x83   :  { %3325 = vmatpush2.bf16.msra.mxu1 %v4916_v43  ;;  %3285 = vmatprep.subr.bf16.mxu0 %v4917_v44  ;;  %v4992_v43 = vld [vmem:[#allocation5 + $0x300] ss:$8 sps:$4 sm:$0xff]   ;;  %v4997_v44 = vld [vmem:[#allocation5 + $0x2f4] ss:$8 sps:$4 sm:$0xff]  }
  0x84   :  { %3326 = vmatprep.subr.bf16.mxu1 %v4919_v45  ;;  %v5000_v45 = vld [vmem:[#allocation5 + $0x3f4] ss:$8 sps:$4 sm:$0xff]  }
  0x86   :  { %3286 = vmatpush2.bf16.msra.mxu0 %v4921_v47  ;;  %v4998_v47 = vld [vmem:[#allocation5 + $0x3f0] ss:$8 sps:$4 sm:$0xff]  }
  0x87   :  { %3327 = vmatpush2.bf16.msra.mxu1 %v4922_v48  ;;  %3287 = vmatprep.subr.bf16.mxu0 %v4923_v51  ;;  %v5003_v48 = vld [vmem:[#allocation5 + $0x2e4] ss:$8 sps:$4 sm:$0xff]   ;;  %v5004_v51 = vld [vmem:[#allocation5 + $0x3e0] ss:$8 sps:$4 sm:$0xff]  }
  0x88   :  { %3328 = vmatprep.subr.bf16.mxu1 %v4925_v53  ;;  %v5012_v53 = vld [vmem:[#allocation5 + $0x3d4] ss:$8 sps:$4 sm:$0xff]  }
  0x8a   :  { %3288 = vmatpush2.bf16.msra.mxu0 %v4927_v54  ;;  %v5007_v54 = vld [vmem:[#allocation5 + $0x2d0] ss:$8 sps:$4 sm:$0xff]  }
  0x8b   :  { %3329 = vmatpush2.bf16.msra.mxu1 %v4928_v55  ;;  %3289 = vmatprep.subr.bf16.mxu0 %v4929_v56  ;;  %v5010_v55 = vld [vmem:[#allocation5 + $0x3d0] ss:$8 sps:$4 sm:$0xff]   ;;  %v5015_v56 = vld [vmem:[#allocation5 + $0x2c4] ss:$8 sps:$4 sm:$0xff]  }
  0x8c   :  { %3330 = vmatprep.subr.bf16.mxu1 %v4931_v57  ;;  %v5018_v57 = vld [vmem:[#allocation5 + $0x3c4] ss:$8 sps:$4 sm:$0xff]  }
  0x8e   :  { %3290 = vmatpush2.bf16.msra.mxu0 %v4933_v58  ;;  %v5013_v58 = vld [vmem:[#allocation5 + $0x2c0] ss:$8 sps:$4 sm:$0xff]  }
  0x8f   :  { %3331 = vmatpush2.bf16.msra.mxu1 %v4934_v59  ;;  %3291 = vmatprep.subr.bf16.mxu0 %v4935_v60  ;;  %v5016_v59 = vld [vmem:[#allocation5 + $0x3c0] ss:$8 sps:$4 sm:$0xff]   ;;  %v5021_v60 = vld [vmem:[#allocation5 + $0x2b4] ss:$8 sps:$4 sm:$0xff]  }
  0x90   :  { %3332 = vmatprep.subr.bf16.mxu1 %v4937_v61  ;;  %v5024_v61 = vld [vmem:[#allocation5 + $0x3b4] ss:$8 sps:$4 sm:$0xff]  }
  0x92   :  { %3292 = vmatpush2.bf16.msra.mxu0 %v4939_v62  ;;  %v5019_v62 = vld [vmem:[#allocation5 + $0x2b0] ss:$8 sps:$4 sm:$0xff]  }
  0x93   :  { %3333 = vmatpush2.bf16.msra.mxu1 %v4940_v63  ;;  %3293 = vmatprep.subr.bf16.mxu0 %v4941_v0  ;;  %v5022_v63 = vld [vmem:[#allocation5 + $0x3b0] ss:$8 sps:$4 sm:$0xff]   ;;  %v5027_v0 = vld [vmem:[#allocation5 + $0x2a4] ss:$8 sps:$4 sm:$0xff]  }
  0x94   :  { %3334 = vmatprep.subr.bf16.mxu1 %v4943_v1  ;;  %v5030_v1 = vld [vmem:[#allocation5 + $0x3a4] ss:$8 sps:$4 sm:$0xff]  }
  0x96   :  { %3294 = vmatpush2.bf16.msra.mxu0 %v4945_v2  ;;  %v5025_v2 = vld [vmem:[#allocation5 + $0x2a0] ss:$8 sps:$4 sm:$0xff]  }
  0x97   :  { %3335 = vmatpush2.bf16.msra.mxu1 %v4946_v3  ;;  %3345 = vmatprep.subr.bf16.mxu0 %v4949_v6  ;;  %v5028_v3 = vld [vmem:[#allocation5 + $0x3a0] ss:$8 sps:$4 sm:$0xff]   ;;  %v5031_v6 = vld [vmem:[#allocation5 + $0x290] ss:$8 sps:$4 sm:$0xff]  }
  0x98   :  { %3386 = vmatprep.subr.bf16.mxu1 %v4952_v7  ;;  %v5034_v7 = vld [vmem:[#allocation5 + $0x390] ss:$8 sps:$4 sm:$0xff]  }
  0x99   :  { %3296 = vmatmul.mubr.bf16.vlgmr.msra.gmra.mxu0 %v147_v8  ;;  %v5039_v8 = vld [vmem:[#allocation5 + $0x284] ss:$8 sps:$4 sm:$0xff]  }
  0x9a   :  { %3337 = vmatmul.mubr.bf16.vlgmr.msra.gmra.mxu1 %v149_v9  ;;  %3346 = vmatpush1.bf16.msra.mxu0 %v4947_v10  ;;  %v5042_v9 = vld [vmem:[#allocation5 + $0x384] ss:$8 sps:$4 sm:$0xff]   ;;  %v5037_v10 = vld [vmem:[#allocation5 + $0x280] ss:$8 sps:$4 sm:$0xff]  }
  0x9b   :  { %3387 = vmatpush1.bf16.msra.mxu1 %v4950_v11  ;;  %3347 = vmatprep.subr.bf16.mxu0 %v4955_v12  ;;  %v5040_v11 = vld [vmem:[#allocation5 + $0x380] ss:$8 sps:$4 sm:$0xff]  }
  0x9c   :  { %3388 = vmatprep.subr.bf16.mxu1 %v4958_v13  ;;  %3377 = vmatprep.mubr.bf16.mxu0 %v152_v37  ;;  %v119_v12 = vld [vmem:[#allocation2 + $0x20] sm:$0xff]  ;;  %v121_v13 = vld [vmem:[#allocation2 + $0x30] sm:$0xff] }
  0x9d   :  { %3418 = vmatprep.mubr.bf16.mxu1 %v154_v40  ;;  %v5072_v37 = vld [vmem:[#allocation5 + $0x534] ss:$8 sps:$4 sm:$0xff]   ;;  %v5075_v40 = vld [vmem:[#allocation5 + $0x424] ss:$8 sps:$4 sm:$0xff]  }
  0x9e   :  { %3348 = vmatpush1.bf16.msra.mxu0 %v4953_v14  ;;  %v5045_v14 = vld [vmem:[#allocation5 + $0x474] ss:$8 sps:$4 sm:$0xff]  }
  0x9f   :  { %3389 = vmatpush1.bf16.msra.mxu1 %v4956_v15  ;;  %3349 = vmatprep.subr.bf16.mxu0 %v4961_v16  ;;  %v5048_v15 = vld [vmem:[#allocation5 + $0x574] ss:$8 sps:$4 sm:$0xff]   ;;  %v151_v16 = vpack.c.bf16 %v119_v12, %v119_v12 }
  0xa0   :  { %3390 = vmatprep.subr.bf16.mxu1 %v4964_v17  ;;  %v153_v17 = vpack.c.bf16 %v121_v13, %v121_v13  ;;  %v5129_v12 = vld [vmem:[#allocation5 + $0x494] ss:$8 sps:$4 sm:$0xff]  }
  0xa1   :  { %v5132_v13 = vld [vmem:[#allocation5 + $0x594] ss:$8 sps:$4 sm:$0xff]  }
  0xa2   :  { %3350 = vmatpush1.bf16.msra.mxu0 %v4959_v18  ;;  %v5043_v18 = vld [vmem:[#allocation5 + $0x470] ss:$8 sps:$4 sm:$0xff]  }
  0xa3   :  { %3391 = vmatpush1.bf16.msra.mxu1 %v4962_v19  ;;  %3351 = vmatprep.subr.bf16.mxu0 %v4967_v20  ;;  %v5046_v19 = vld [vmem:[#allocation5 + $0x570] ss:$8 sps:$4 sm:$0xff]   ;;  %v5051_v20 = vld [vmem:[#allocation5 + $0x464] ss:$8 sps:$4 sm:$0xff]  }
  0xa4   :  { %3392 = vmatprep.subr.bf16.mxu1 %v4970_v21  ;;  %v5054_v21 = vld [vmem:[#allocation5 + $0x564] ss:$8 sps:$4 sm:$0xff]  }
  0xa6   :  { %3352 = vmatpush1.bf16.msra.mxu0 %v4965_v22  ;;  %v124_v22 = vld [vmem:[#allocation2 + $0x48] sm:$0xff] }
  0xa7   :  { %3393 = vmatpush1.bf16.msra.mxu1 %v4968_v23  ;;  %3353 = vmatprep.subr.bf16.mxu0 %v4973_v24  ;;  %v5049_v23 = vld [vmem:[#allocation5 + $0x460] ss:$8 sps:$4 sm:$0xff]  }
  0xa8   :  { %3394 = vmatprep.subr.bf16.mxu1 %v4976_v25  ;;  %v5052_v24 = vld [vmem:[#allocation5 + $0x560] ss:$8 sps:$4 sm:$0xff]   ;;  %v156_v25 = vpack.c.bf16 %v124_v22, %v124_v22  ;;  %v5141_v22 = vld [vmem:[#allocation5 + $0x674] ss:$8 sps:$4 sm:$0xff]  }
  0xaa   :  { %3354 = vmatpush1.bf16.msra.mxu0 %v4971_v26  ;;  %v126_v26 = vld [vmem:[#allocation2 + $0x58] sm:$0xff] }
  0xab   :  { %3395 = vmatpush1.bf16.msra.mxu1 %v4974_v27  ;;  %3355 = vmatprep.subr.bf16.mxu0 %v4979_v28  ;;  %v5057_v27 = vld [vmem:[#allocation5 + $0x454] ss:$8 sps:$4 sm:$0xff]   ;;  %v158_v28 = vpack.c.bf16 %v126_v26, %v126_v26 }
  0xac   :  { %3396 = vmatprep.subr.bf16.mxu1 %v4982_v29  ;;  %v5060_v29 = vld [vmem:[#allocation5 + $0x554] ss:$8 sps:$4 sm:$0xff]  }
  0xae   :  { %3356 = vmatpush1.bf16.msra.mxu0 %v4977_v30  ;;  %v5055_v30 = vld [vmem:[#allocation5 + $0x450] ss:$8 sps:$4 sm:$0xff]  }
  0xaf   :  { %3397 = vmatpush1.bf16.msra.mxu1 %v4980_v31  ;;  %3357 = vmatprep.subr.bf16.mxu0 %v4985_v32  ;;  %v5058_v31 = vld [vmem:[#allocation5 + $0x550] ss:$8 sps:$4 sm:$0xff]   ;;  %v5063_v32 = vld [vmem:[#allocation5 + $0x444] ss:$8 sps:$4 sm:$0xff]  }
  0xb0   :  { %3398 = vmatprep.subr.bf16.mxu1 %v4988_v33  ;;  %v5066_v33 = vld [vmem:[#allocation5 + $0x544] ss:$8 sps:$4 sm:$0xff]  }
  0xb2   :  { %3358 = vmatpush1.bf16.msra.mxu0 %v4983_v35  ;;  %v5064_v35 = vld [vmem:[#allocation5 + $0x540] ss:$8 sps:$4 sm:$0xff]  }
  0xb3   :  { %3399 = vmatpush1.bf16.msra.mxu1 %v4986_v36  ;;  %3359 = vmatprep.subr.bf16.mxu0 %v4991_v39  ;;  %v5069_v36 = vld [vmem:[#allocation5 + $0x434] ss:$8 sps:$4 sm:$0xff]   ;;  %v5070_v39 = vld [vmem:[#allocation5 + $0x530] ss:$8 sps:$4 sm:$0xff]  }
  0xb4   :  { %3400 = vmatprep.subr.bf16.mxu1 %v4994_v41  ;;  %v5078_v41 = vld [vmem:[#allocation5 + $0x524] ss:$8 sps:$4 sm:$0xff]  }
  0xb6   :  { %3360 = vmatpush1.bf16.msra.mxu0 %v4989_v42  ;;  %v5073_v42 = vld [vmem:[#allocation5 + $0x420] ss:$8 sps:$4 sm:$0xff]  }
  0xb7   :  { %3401 = vmatpush1.bf16.msra.mxu1 %v4992_v43  ;;  %3361 = vmatprep.subr.bf16.mxu0 %v4997_v44  ;;  %v5076_v43 = vld [vmem:[#allocation5 + $0x520] ss:$8 sps:$4 sm:$0xff]   ;;  %v5081_v44 = vld [vmem:[#allocation5 + $0x414] ss:$8 sps:$4 sm:$0xff]  }
  0xb8   :  { %3402 = vmatprep.subr.bf16.mxu1 %v5000_v45  ;;  %v5084_v45 = vld [vmem:[#allocation5 + $0x514] ss:$8 sps:$4 sm:$0xff]  }
  0xba   :  { %3362 = vmatpush2.bf16.msra.mxu0 %v4995_v46  ;;  %v5079_v46 = vld [vmem:[#allocation5 + $0x410] ss:$8 sps:$4 sm:$0xff]  }
  0xbb   :  { %3403 = vmatpush2.bf16.msra.mxu1 %v4998_v47  ;;  %3363 = vmatprep.subr.bf16.mxu0 %v5003_v48  ;;  %v5082_v47 = vld [vmem:[#allocation5 + $0x510] ss:$8 sps:$4 sm:$0xff]   ;;  %v5087_v48 = vld [vmem:[#allocation5 + $0x404] ss:$8 sps:$4 sm:$0xff]  }
  0xbc   :  { %3404 = vmatprep.subr.bf16.mxu1 %v5006_v49  ;;  %v5090_v49 = vld [vmem:[#allocation5 + $0x504] ss:$8 sps:$4 sm:$0xff]  }
  0xbe   :  { %3364 = vmatpush2.bf16.msra.mxu0 %v5001_v50  ;;  %v5085_v50 = vld [vmem:[#allocation5 + $0x400] ss:$8 sps:$4 sm:$0xff]  }
  0xbf   :  { %3405 = vmatpush2.bf16.msra.mxu1 %v5004_v51  ;;  %3365 = vmatprep.subr.bf16.mxu0 %v5009_v52  ;;  %v5088_v51 = vld [vmem:[#allocation5 + $0x500] ss:$8 sps:$4 sm:$0xff]   ;;  %v5093_v52 = vld [vmem:[#allocation5 + $0x4f4] ss:$8 sps:$4 sm:$0xff]  }
  0xc0   :  { %3406 = vmatprep.subr.bf16.mxu1 %v5012_v53  ;;  %v5096_v53 = vld [vmem:[#allocation5 + $0x5f4] ss:$8 sps:$4 sm:$0xff]  }
  0xc2   :  { %3366 = vmatpush2.bf16.msra.mxu0 %v5007_v54  ;;  %v5091_v54 = vld [vmem:[#allocation5 + $0x4f0] ss:$8 sps:$4 sm:$0xff]  }
  0xc3   :  { %3407 = vmatpush2.bf16.msra.mxu1 %v5010_v55  ;;  %3367 = vmatprep.subr.bf16.mxu0 %v5015_v56  ;;  %v5094_v55 = vld [vmem:[#allocation5 + $0x5f0] ss:$8 sps:$4 sm:$0xff]   ;;  %v5099_v56 = vld [vmem:[#allocation5 + $0x4e4] ss:$8 sps:$4 sm:$0xff]  }
  0xc4   :  { %3408 = vmatprep.subr.bf16.mxu1 %v5018_v57  ;;  %v5102_v57 = vld [vmem:[#allocation5 + $0x5e4] ss:$8 sps:$4 sm:$0xff]  }
  0xc6   :  { %3368 = vmatpush2.bf16.msra.mxu0 %v5013_v58  ;;  %v5097_v58 = vld [vmem:[#allocation5 + $0x4e0] ss:$8 sps:$4 sm:$0xff]  }
  0xc7   :  { %3409 = vmatpush2.bf16.msra.mxu1 %v5016_v59  ;;  %3369 = vmatprep.subr.bf16.mxu0 %v5021_v60  ;;  %v5100_v59 = vld [vmem:[#allocation5 + $0x5e0] ss:$8 sps:$4 sm:$0xff]   ;;  %v5105_v60 = vld [vmem:[#allocation5 + $0x4d4] ss:$8 sps:$4 sm:$0xff]  }
  0xc8   :  { %3410 = vmatprep.subr.bf16.mxu1 %v5024_v61  ;;  %v5108_v61 = vld [vmem:[#allocation5 + $0x5d4] ss:$8 sps:$4 sm:$0xff]  }
  0xca   :  { %3370 = vmatpush2.bf16.msra.mxu0 %v5019_v62  ;;  %v5103_v62 = vld [vmem:[#allocation5 + $0x4d0] ss:$8 sps:$4 sm:$0xff]  }
  0xcb   :  { %3411 = vmatpush2.bf16.msra.mxu1 %v5022_v63  ;;  %3371 = vmatprep.subr.bf16.mxu0 %v5027_v0  ;;  %v5106_v63 = vld [vmem:[#allocation5 + $0x5d0] ss:$8 sps:$4 sm:$0xff]   ;;  %v5111_v0 = vld [vmem:[#allocation5 + $0x4c4] ss:$8 sps:$4 sm:$0xff]  }
  0xcc   :  { %3412 = vmatprep.subr.bf16.mxu1 %v5030_v1  ;;  %v5114_v1 = vld [vmem:[#allocation5 + $0x5c4] ss:$8 sps:$4 sm:$0xff]  }
  0xce   :  { %3372 = vmatpush2.bf16.msra.mxu0 %v5025_v2  ;;  %v5109_v2 = vld [vmem:[#allocation5 + $0x4c0] ss:$8 sps:$4 sm:$0xff]  }
  0xcf   :  { %3413 = vmatpush2.bf16.msra.mxu1 %v5028_v3  ;;  %3373 = vmatprep.subr.bf16.mxu0 %v5033_v4  ;;  %v5112_v3 = vld [vmem:[#allocation5 + $0x5c0] ss:$8 sps:$4 sm:$0xff]   ;;  %v5117_v4 = vld [vmem:[#allocation5 + $0x4b4] ss:$8 sps:$4 sm:$0xff]  }
  0xd0   :  { %3414 = vmatprep.subr.bf16.mxu1 %v5036_v5  ;;  %v5120_v5 = vld [vmem:[#allocation5 + $0x5b4] ss:$8 sps:$4 sm:$0xff]  }
  0xd2   :  { %3374 = vmatpush2.bf16.msra.mxu0 %v5031_v6  ;;  %v5115_v6 = vld [vmem:[#allocation5 + $0x4b0] ss:$8 sps:$4 sm:$0xff]  }
  0xd3   :  { %3415 = vmatpush2.bf16.msra.mxu1 %v5034_v7  ;;  %3375 = vmatprep.subr.bf16.mxu0 %v5039_v8  ;;  %v5118_v7 = vld [vmem:[#allocation5 + $0x5b0] ss:$8 sps:$4 sm:$0xff]   ;;  %v5123_v8 = vld [vmem:[#allocation5 + $0x4a4] ss:$8 sps:$4 sm:$0xff]  }
  0xd4   :  { %3416 = vmatprep.subr.bf16.mxu1 %v5042_v9  ;;  %v5126_v9 = vld [vmem:[#allocation5 + $0x5a4] ss:$8 sps:$4 sm:$0xff]  }
  0xd6   :  { %3376 = vmatpush2.bf16.msra.mxu0 %v5037_v10  ;;  %v5121_v10 = vld [vmem:[#allocation5 + $0x4a0] ss:$8 sps:$4 sm:$0xff]  }
  0xd7   :  { %3417 = vmatpush2.bf16.msra.mxu1 %v5040_v11  ;;  %3427 = vmatprep.subr.bf16.mxu0 %v5045_v14  ;;  %v5124_v11 = vld [vmem:[#allocation5 + $0x5a0] ss:$8 sps:$4 sm:$0xff]   ;;  %v5127_v14 = vld [vmem:[#allocation5 + $0x490] ss:$8 sps:$4 sm:$0xff]  }
  0xd8   :  { %3468 = vmatprep.subr.bf16.mxu1 %v5048_v15  ;;  %v5130_v15 = vld [vmem:[#allocation5 + $0x590] ss:$8 sps:$4 sm:$0xff]  }
  0xd9   :  { %3378 = vmatmul.mubr.bf16.vlgmr.msra.gmra.mxu0 %v151_v16  ;;  %v5135_v16 = vld [vmem:[#allocation5 + $0x484] ss:$8 sps:$4 sm:$0xff]  }
  0xda   :  { %3419 = vmatmul.mubr.bf16.vlgmr.msra.gmra.mxu1 %v153_v17  ;;  %3428 = vmatpush1.bf16.msra.mxu0 %v5043_v18  ;;  %v5138_v17 = vld [vmem:[#allocation5 + $0x584] ss:$8 sps:$4 sm:$0xff]   ;;  %v5133_v18 = vld [vmem:[#allocation5 + $0x480] ss:$8 sps:$4 sm:$0xff]  }
  0xdb   :  { %3469 = vmatpush1.bf16.msra.mxu1 %v5046_v19  ;;  %3429 = vmatprep.subr.bf16.mxu0 %v5051_v20  ;;  %v5136_v19 = vld [vmem:[#allocation5 + $0x580] ss:$8 sps:$4 sm:$0xff]  }
  0xdc   :  { %3470 = vmatprep.subr.bf16.mxu1 %v5054_v21  ;;  %3459 = vmatprep.mubr.bf16.mxu0 %v156_v25  ;;  %v123_v20 = vld [vmem:[#allocation2 + $0x40] sm:$0xff]  ;;  %v125_v21 = vld [vmem:[#allocation2 + $0x50] sm:$0xff]  ;;  %v128_v25 = vld [vmem:[#allocation2 + $0x68] sm:$0xff] }
  0xdd   :  { %3500 = vmatprep.mubr.bf16.mxu1 %v158_v28  ;;  %v155_v26 = vpack.c.bf16 %v123_v20, %v123_v20  ;;  %v130_v28 = vld [vmem:[#allocation2 + $0x78] sm:$0xff]  ;;  %v693_v20 = vlaneseq }
  0xde   :  { %3430 = vmatpush1.bf16.msra.mxu0 %v5049_v23  ;;  %v5144_v23 = vld [vmem:[#allocation5 + $0x774] ss:$8 sps:$4 sm:$0xff]  }
  0xdf   :  { %3471 = vmatpush1.bf16.msra.mxu1 %v5052_v24  ;;  %3431 = vmatprep.subr.bf16.mxu0 %v5057_v27  ;;  %v5139_v24 = vld [vmem:[#allocation5 + $0x670] ss:$8 sps:$4 sm:$0xff]   ;;  %v157_v27 = vpack.c.bf16 %v125_v21, %v125_v21  ;;  %v5225_v21 = vld [vmem:[#allocation5 + $0x694] ss:$8 sps:$4 sm:$0xff]  }
  0xe0   :  { %3472 = vmatprep.subr.bf16.mxu1 %v5060_v29  ;;  %v5142_v29 = vld [vmem:[#allocation5 + $0x770] ss:$8 sps:$4 sm:$0xff]  }
  0xe2   :  { %3432 = vmatpush1.bf16.msra.mxu0 %v5055_v30  ;;  %v5147_v30 = vld [vmem:[#allocation5 + $0x664] ss:$8 sps:$4 sm:$0xff]  }
  0xe3   :  { %3473 = vmatpush1.bf16.msra.mxu1 %v5058_v31  ;;  %3433 = vmatprep.subr.bf16.mxu0 %v5063_v32  ;;  %v5150_v31 = vld [vmem:[#allocation5 + $0x764] ss:$8 sps:$4 sm:$0xff]   ;;  %v160_v32 = vpack.c.bf16 %v128_v25, %v128_v25  ;;  %v694_v25 = vshrl.u32 %v693_v20, 7 }
  0xe4   :  { %3474 = vmatprep.subr.bf16.mxu1 %v5066_v33  ;;  %v162_v33 = vpack.c.bf16 %v130_v28, %v130_v28  ;;  %v5229_v28 = vld [vmem:[#allocation5 + $0x680] ss:$8 sps:$4 sm:$0xff]   ;;  %v5282_v20 = vld [vmem:[#allocation5 + $0x904] ss:$8 sps:$4 sm:$0xff]  }
  0xe6   :  { %3434 = vmatpush1.bf16.msra.mxu0 %v5061_v34  ;;  %v5145_v34 = vld [vmem:[#allocation5 + $0x660] ss:$8 sps:$4 sm:$0xff]  }
  0xe7   :  { %3475 = vmatpush1.bf16.msra.mxu1 %v5064_v35  ;;  %3435 = vmatprep.subr.bf16.mxu0 %v5069_v36  ;;  %v5148_v35 = vld [vmem:[#allocation5 + $0x760] ss:$8 sps:$4 sm:$0xff]   ;;  %v5153_v36 = vld [vmem:[#allocation5 + $0x654] ss:$8 sps:$4 sm:$0xff]  }
  0xe8   :  { %3476 = vmatprep.subr.bf16.mxu1 %v5072_v37  ;;  %v5156_v37 = vld [vmem:[#allocation5 + $0x754] ss:$8 sps:$4 sm:$0xff]  }
  0xea   :  { %3436 = vmatpush1.bf16.msra.mxu0 %v5067_v38  ;;  %v5151_v38 = vld [vmem:[#allocation5 + $0x650] ss:$8 sps:$4 sm:$0xff]  }
  0xeb   :  { %3477 = vmatpush1.bf16.msra.mxu1 %v5070_v39  ;;  %3437 = vmatprep.subr.bf16.mxu0 %v5075_v40  ;;  %v5154_v39 = vld [vmem:[#allocation5 + $0x750] ss:$8 sps:$4 sm:$0xff]   ;;  %v5159_v40 = vld [vmem:[#allocation5 + $0x644] ss:$8 sps:$4 sm:$0xff]  }
  0xec   :  { %3478 = vmatprep.subr.bf16.mxu1 %v5078_v41  ;;  %v5162_v41 = vld [vmem:[#allocation5 + $0x744] ss:$8 sps:$4 sm:$0xff]  }
  0xee   :  { %3438 = vmatpush1.bf16.msra.mxu0 %v5073_v42  ;;  %v5157_v42 = vld [vmem:[#allocation5 + $0x640] ss:$8 sps:$4 sm:$0xff]  }
  0xef   :  { %3479 = vmatpush1.bf16.msra.mxu1 %v5076_v43  ;;  %3439 = vmatprep.subr.bf16.mxu0 %v5081_v44  ;;  %v5160_v43 = vld [vmem:[#allocation5 + $0x740] ss:$8 sps:$4 sm:$0xff]   ;;  %v5165_v44 = vld [vmem:[#allocation5 + $0x634] ss:$8 sps:$4 sm:$0xff]  }
  0xf0   :  { %3480 = vmatprep.subr.bf16.mxu1 %v5084_v45  ;;  %v5168_v45 = vld [vmem:[#allocation5 + $0x734] ss:$8 sps:$4 sm:$0xff]  }
  0xf2   :  { %3440 = vmatpush1.bf16.msra.mxu0 %v5079_v46  ;;  %v5163_v46 = vld [vmem:[#allocation5 + $0x630] ss:$8 sps:$4 sm:$0xff]  }
  0xf3   :  { %3481 = vmatpush1.bf16.msra.mxu1 %v5082_v47  ;;  %3441 = vmatprep.subr.bf16.mxu0 %v5087_v48  ;;  %v5166_v47 = vld [vmem:[#allocation5 + $0x730] ss:$8 sps:$4 sm:$0xff]   ;;  %v5171_v48 = vld [vmem:[#allocation5 + $0x624] ss:$8 sps:$4 sm:$0xff]  }
  0xf4   :  { %3482 = vmatprep.subr.bf16.mxu1 %v5090_v49  ;;  %v5174_v49 = vld [vmem:[#allocation5 + $0x724] ss:$8 sps:$4 sm:$0xff]  }
  0xf6   :  { %3442 = vmatpush1.bf16.msra.mxu0 %v5085_v50  ;;  %v5169_v50 = vld [vmem:[#allocation5 + $0x620] ss:$8 sps:$4 sm:$0xff]  }
  0xf7   :  { %3483 = vmatpush1.bf16.msra.mxu1 %v5088_v51  ;;  %3443 = vmatprep.subr.bf16.mxu0 %v5093_v52  ;;  %v5172_v51 = vld [vmem:[#allocation5 + $0x720] ss:$8 sps:$4 sm:$0xff]   ;;  %v5177_v52 = vld [vmem:[#allocation5 + $0x614] ss:$8 sps:$4 sm:$0xff]  }
  0xf8   :  { %3484 = vmatprep.subr.bf16.mxu1 %v5096_v53  ;;  %v5180_v53 = vld [vmem:[#allocation5 + $0x714] ss:$8 sps:$4 sm:$0xff]  }
  0xfa   :  { %3444 = vmatpush2.bf16.msra.mxu0 %v5091_v54  ;;  %v5175_v54 = vld [vmem:[#allocation5 + $0x610] ss:$8 sps:$4 sm:$0xff]  }
  0xfb   :  { %3485 = vmatpush2.bf16.msra.mxu1 %v5094_v55  ;;  %3445 = vmatprep.subr.bf16.mxu0 %v5099_v56  ;;  %v5178_v55 = vld [vmem:[#allocation5 + $0x710] ss:$8 sps:$4 sm:$0xff]   ;;  %v5183_v56 = vld [vmem:[#allocation5 + $0x604] ss:$8 sps:$4 sm:$0xff]  }
  0xfc   :  { %3486 = vmatprep.subr.bf16.mxu1 %v5102_v57  ;;  %v5186_v57 = vld [vmem:[#allocation5 + $0x704] ss:$8 sps:$4 sm:$0xff]  }
  0xfe   :  { %3446 = vmatpush2.bf16.msra.mxu0 %v5097_v58  ;;  %v5181_v58 = vld [vmem:[#allocation5 + $0x600] ss:$8 sps:$4 sm:$0xff]  }
  0xff   :  { %3487 = vmatpush2.bf16.msra.mxu1 %v5100_v59  ;;  %3447 = vmatprep.subr.bf16.mxu0 %v5105_v60  ;;  %v5184_v59 = vld [vmem:[#allocation5 + $0x700] ss:$8 sps:$4 sm:$0xff]   ;;  %v5189_v60 = vld [vmem:[#allocation5 + $0x6f4] ss:$8 sps:$4 sm:$0xff]  }
 0x100   :  { %3488 = vmatprep.subr.bf16.mxu1 %v5108_v61  ;;  %v5192_v61 = vld [vmem:[#allocation5 + $0x7f4] ss:$8 sps:$4 sm:$0xff]  }
 0x102   :  { %3448 = vmatpush2.bf16.msra.mxu0 %v5103_v62  ;;  %v5187_v62 = vld [vmem:[#allocation5 + $0x6f0] ss:$8 sps:$4 sm:$0xff]  }
 0x103   :  { %3489 = vmatpush2.bf16.msra.mxu1 %v5106_v63  ;;  %3449 = vmatprep.subr.bf16.mxu0 %v5111_v0  ;;  %v5190_v63 = vld [vmem:[#allocation5 + $0x7f0] ss:$8 sps:$4 sm:$0xff]   ;;  %v5195_v0 = vld [vmem:[#allocation5 + $0x6e4] ss:$8 sps:$4 sm:$0xff]  }
 0x104   :  { %3490 = vmatprep.subr.bf16.mxu1 %v5114_v1  ;;  %v5198_v1 = vld [vmem:[#allocation5 + $0x7e4] ss:$8 sps:$4 sm:$0xff]  }
 0x106   :  { %3450 = vmatpush2.bf16.msra.mxu0 %v5109_v2  ;;  %v5193_v2 = vld [vmem:[#allocation5 + $0x6e0] ss:$8 sps:$4 sm:$0xff]  }
 0x107   :  { %3491 = vmatpush2.bf16.msra.mxu1 %v5112_v3  ;;  %3451 = vmatprep.subr.bf16.mxu0 %v5117_v4  ;;  %v5196_v3 = vld [vmem:[#allocation5 + $0x7e0] ss:$8 sps:$4 sm:$0xff]   ;;  %v5201_v4 = vld [vmem:[#allocation5 + $0x6d4] ss:$8 sps:$4 sm:$0xff]  }
 0x108   :  { %3492 = vmatprep.subr.bf16.mxu1 %v5120_v5  ;;  %v5204_v5 = vld [vmem:[#allocation5 + $0x7d4] ss:$8 sps:$4 sm:$0xff]  }
 0x10a   :  { %3452 = vmatpush2.bf16.msra.mxu0 %v5115_v6  ;;  %v5199_v6 = vld [vmem:[#allocation5 + $0x6d0] ss:$8 sps:$4 sm:$0xff]  }
 0x10b   :  { %3493 = vmatpush2.bf16.msra.mxu1 %v5118_v7  ;;  %3453 = vmatprep.subr.bf16.mxu0 %v5123_v8  ;;  %v5202_v7 = vld [vmem:[#allocation5 + $0x7d0] ss:$8 sps:$4 sm:$0xff]   ;;  %v5207_v8 = vld [vmem:[#allocation5 + $0x6c4] ss:$8 sps:$4 sm:$0xff]  }
 0x10c   :  { %3494 = vmatprep.subr.bf16.mxu1 %v5126_v9  ;;  %v5210_v9 = vld [vmem:[#allocation5 + $0x7c4] ss:$8 sps:$4 sm:$0xff]  }
 0x10e   :  { %3454 = vmatpush2.bf16.msra.mxu0 %v5121_v10  ;;  %v5205_v10 = vld [vmem:[#allocation5 + $0x6c0] ss:$8 sps:$4 sm:$0xff]  }
 0x10f   :  { %3495 = vmatpush2.bf16.msra.mxu1 %v5124_v11  ;;  %3455 = vmatprep.subr.bf16.mxu0 %v5129_v12  ;;  %v5208_v11 = vld [vmem:[#allocation5 + $0x7c0] ss:$8 sps:$4 sm:$0xff]   ;;  %v5213_v12 = vld [vmem:[#allocation5 + $0x6b4] ss:$8 sps:$4 sm:$0xff]  }
 0x110   :  { %3496 = vmatprep.subr.bf16.mxu1 %v5132_v13  ;;  %v5216_v13 = vld [vmem:[#allocation5 + $0x7b4] ss:$8 sps:$4 sm:$0xff]  }
 0x112   :  { %3456 = vmatpush2.bf16.msra.mxu0 %v5127_v14  ;;  %v5211_v14 = vld [vmem:[#allocation5 + $0x6b0] ss:$8 sps:$4 sm:$0xff]  }
 0x113   :  { %3497 = vmatpush2.bf16.msra.mxu1 %v5130_v15  ;;  %3457 = vmatprep.subr.bf16.mxu0 %v5135_v16  ;;  %v5214_v15 = vld [vmem:[#allocation5 + $0x7b0] ss:$8 sps:$4 sm:$0xff]   ;;  %v5219_v16 = vld [vmem:[#allocation5 + $0x6a4] ss:$8 sps:$4 sm:$0xff]  }
 0x114   :  { %3498 = vmatprep.subr.bf16.mxu1 %v5138_v17  ;;  %v5222_v17 = vld [vmem:[#allocation5 + $0x7a4] ss:$8 sps:$4 sm:$0xff]  }
 0x116   :  { %3458 = vmatpush2.bf16.msra.mxu0 %v5133_v18  ;;  %v5217_v18 = vld [vmem:[#allocation5 + $0x6a0] ss:$8 sps:$4 sm:$0xff]  }
 0x117   :  { %3499 = vmatpush2.bf16.msra.mxu1 %v5136_v19  ;;  %3509 = vmatprep.subr.bf16.mxu0 %v5141_v22  ;;  %v5220_v19 = vld [vmem:[#allocation5 + $0x7a0] ss:$8 sps:$4 sm:$0xff]   ;;  %v5228_v22 = vld [vmem:[#allocation5 + $0x794] ss:$8 sps:$4 sm:$0xff]  }
 0x118   :  { %3550 = vmatprep.subr.bf16.mxu1 %v5144_v23  ;;  %v5223_v23 = vld [vmem:[#allocation5 + $0x690] ss:$8 sps:$4 sm:$0xff]  }
 0x119   :  { %3460 = vmatmul.mubr.bf16.vlgmr.msra.gmra.mxu0 %v155_v26  ;;  %v5231_v26 = vld [vmem:[#allocation5 + $0x684] ss:$8 sps:$4 sm:$0xff]  }
 0x11a   :  { %3501 = vmatmul.mubr.bf16.vlgmr.msra.gmra.mxu1 %v157_v27  ;;  %3510 = vmatpush1.bf16.msra.mxu0 %v5139_v24  ;;  %v5226_v24 = vld [vmem:[#allocation5 + $0x790] ss:$8 sps:$4 sm:$0xff]   ;;  %v5234_v27 = vld [vmem:[#allocation5 + $0x784] ss:$8 sps:$4 sm:$0xff]  }
 0x11b   :  { %3551 = vmatpush1.bf16.msra.mxu1 %v5142_v29  ;;  %3511 = vmatprep.subr.bf16.mxu0 %v5147_v30  ;;  %v5232_v29 = vld [vmem:[#allocation5 + $0x780] ss:$8 sps:$4 sm:$0xff]  }
 0x11c   :  { %3552 = vmatprep.subr.bf16.mxu1 %v5150_v31  ;;  %3541 = vmatprep.mubr.bf16.mxu0 %v160_v32  ;;  %v691_v30 = vld [vmem:[#allocation7] sm:$0x3]  ;;  %v695_v32 = vsub.s32 0, %v694_v25 }
 0x11d   :  { %3582 = vmatprep.mubr.bf16.mxu1 %v162_v33  ;;  %v127_v31 = vld [vmem:[#allocation2 + $0x60] sm:$0xff]  ;;  %v129_v33 = vld [vmem:[#allocation2 + $0x70] sm:$0xff] }
 0x11e   :  { %3512 = vmatpush1.bf16.msra.mxu0 %v5145_v34  ;;  %v5237_v34 = vld [vmem:[#allocation5 + $0x874] ss:$8 sps:$4 sm:$0xff]  }
 0x11f   :  { %3553 = vmatpush1.bf16.msra.mxu1 %v5148_v35  ;;  %3513 = vmatprep.subr.bf16.mxu0 %v5153_v36  ;;  %v5240_v35 = vld [vmem:[#allocation5 + $0x974] ss:$8 sps:$4 sm:$0xff]   ;;  %v5235_v36 = vld [vmem:[#allocation5 + $0x870] ss:$8 sps:$4 sm:$0xff]  }
 0x120   :  { %3554 = vmatprep.subr.bf16.mxu1 %v5156_v37  ;;  %v699_v37 = vsub.s32 1, %v694_v25  ;;  %v5283_v25 = vld [vmem:[#allocation5 + $0x8f0] ss:$8 sps:$4 sm:$0xff]  }
 0x122   :  { %3514 = vmatpush1.bf16.msra.mxu0 %v5151_v38  ;;  %v132_v38 = vld [vmem:[#allocation2 + $0x88] sm:$0xff] }
 0x123   :  { %3555 = vmatpush1.bf16.msra.mxu1 %v5154_v39  ;;  %3515 = vmatprep.subr.bf16.mxu0 %v5159_v40  ;;  %v159_v39 = vpack.c.bf16 %v127_v31, %v127_v31  ;;  %v161_v40 = vpack.c.bf16 %v129_v33, %v129_v33  ;;  %v5297_v31 = vld [vmem:[#allocation5 + $0x8d4] ss:$8 sps:$4 sm:$0xff]   ;;  %v5295_v33 = vld [vmem:[#allocation5 + $0x8d0] ss:$8 sps:$4 sm:$0xff]  }
 0x124   :  { %3556 = vmatprep.subr.bf16.mxu1 %v5162_v41  ;;  %v134_v41 = vld [vmem:[#allocation2 + $0x98] sm:$0xff] }
 0x126   :  { %3516 = vmatpush1.bf16.msra.mxu0 %v5157_v42  ;;  %v696_v42 = vrot.slane %v691_v30, %v695_v32  ;;  %v5300_v32 = vld [vmem:[#allocation5 + $0x9d4] ss:$8 sps:$4 sm:$0xff]  }
 0x127   :  { %3557 = vmatpush1.bf16.msra.mxu1 %v5160_v43  ;;  %3517 = vmatprep.subr.bf16.mxu0 %v5165_v44  ;;  %v5238_v43 = vld [vmem:[#allocation5 + $0x970] ss:$8 sps:$4 sm:$0xff]   ;;  %v5243_v44 = vld [vmem:[#allocation5 + $0x864] ss:$8 sps:$4 sm:$0xff]  }
 0x128   :  { %3558 = vmatprep.subr.bf16.mxu1 %v5168_v45  ;;  %v5246_v45 = vld [vmem:[#allocation5 + $0x964] ss:$8 sps:$4 sm:$0xff]  }
 0x12a   :  { %3518 = vmatpush1.bf16.msra.mxu0 %v5163_v46  ;;  %v700_v46 = vrot.slane %v691_v30, %v699_v37  ;;  %v5292_v30 = vld [vmem:[#allocation5 + $0x9e0] ss:$8 sps:$4 sm:$0xff]  }
 0x12b   :  { %3559 = vmatpush1.bf16.msra.mxu1 %v5166_v47  ;;  %3519 = vmatprep.subr.bf16.mxu0 %v5171_v48  ;;  %v164_v47 = vpack.c.bf16 %v132_v38, %v132_v38  ;;  %v166_v48 = vpack.c.bf16 %v134_v41, %v134_v41  ;;  %v5301_v37 = vld [vmem:[#allocation5 + $0x8c0] ss:$8 sps:$4 sm:$0xff]   ;;  %v5307_v41 = vld [vmem:[#allocation5 + $0x8b0] ss:$8 sps:$4 sm:$0xff]  }
 0x12c   :  { %3560 = vmatprep.subr.bf16.mxu1 %v5174_v49  ;;  %v5304_v38 = vld [vmem:[#allocation5 + $0x9c0] ss:$8 sps:$4 sm:$0xff]  }
 0x12e   :  { %3520 = vmatpush1.bf16.msra.mxu0 %v5169_v50 }
 0x12f   :  { %3561 = vmatpush1.bf16.msra.mxu1 %v5172_v51  ;;  %3521 = vmatprep.subr.bf16.mxu0 %v5177_v52  ;;  %v5241_v51 = vld [vmem:[#allocation5 + $0x860] ss:$8 sps:$4 sm:$0xff]  }
 0x130   :  { %3562 = vmatprep.subr.bf16.mxu1 %v5180_v53  ;;  %v5244_v53 = vld [vmem:[#allocation5 + $0x960] ss:$8 sps:$4 sm:$0xff]  }
 0x132   :  { %3522 = vmatpush1.bf16.msra.mxu0 %v5175_v54 }
 0x133   :  { %3563 = vmatpush1.bf16.msra.mxu1 %v5178_v55  ;;  %3523 = vmatprep.subr.bf16.mxu0 %v5183_v56  ;;  %v5249_v56 = vld [vmem:[#allocation5 + $0x854] ss:$8 sps:$4 sm:$0xff]  }
 0x134   :  { %3564 = vmatprep.subr.bf16.mxu1 %v5186_v57  ;;  %v5252_v57 = vld [vmem:[#allocation5 + $0x954] ss:$8 sps:$4 sm:$0xff]  }
 0x136   :  { %3524 = vmatpush1.bf16.msra.mxu0 %v5181_v58 }
 0x137   :  { %3565 = vmatpush1.bf16.msra.mxu1 %v5184_v59  ;;  %3525 = vmatprep.subr.bf16.mxu0 %v5189_v60 }
 0x138   :  { %3566 = vmatprep.subr.bf16.mxu1 %v5192_v61 }
 0x13a   :  { %3526 = vmatpush2.bf16.msra.mxu0 %v5187_v62  ;;  %v5247_v62 = vld [vmem:[#allocation5 + $0x850] ss:$8 sps:$4 sm:$0xff]  }
 0x13b   :  { %3567 = vmatpush2.bf16.msra.mxu1 %v5190_v63  ;;  %3527 = vmatprep.subr.bf16.mxu0 %v5195_v0  ;;  %v5250_v0 = vld [vmem:[#allocation5 + $0x950] ss:$8 sps:$4 sm:$0xff]  }
 0x13c   :  { %3568 = vmatprep.subr.bf16.mxu1 %v5198_v1 }
 0x13e   :  { %3528 = vmatpush2.bf16.msra.mxu0 %v5193_v2 }
 0x13f   :  { %3569 = vmatpush2.bf16.msra.mxu1 %v5196_v3  ;;  %3529 = vmatprep.subr.bf16.mxu0 %v5201_v4  ;;  %v5255_v3 = vld [vmem:[#allocation5 + $0x844] ss:$8 sps:$4 sm:$0xff]  }
 0x140   :  { %3570 = vmatprep.subr.bf16.mxu1 %v5204_v5  ;;  %v5258_v4 = vld [vmem:[#allocation5 + $0x944] ss:$8 sps:$4 sm:$0xff]   ;;  %v5253_v5 = vld [vmem:[#allocation5 + $0x840] ss:$8 sps:$4 sm:$0xff]  }
 0x142   :  { %3530 = vmatpush2.bf16.msra.mxu0 %v5199_v6  ;;  %v5256_v6 = vld [vmem:[#allocation5 + $0x940] ss:$8 sps:$4 sm:$0xff]  }
 0x143   :  { %3571 = vmatpush2.bf16.msra.mxu1 %v5202_v7  ;;  %3531 = vmatprep.subr.bf16.mxu0 %v5207_v8  ;;  %v5261_v7 = vld [vmem:[#allocation5 + $0x834] ss:$8 sps:$4 sm:$0xff]  }
 0x144   :  { %3572 = vmatprep.subr.bf16.mxu1 %v5210_v9  ;;  %v5264_v8 = vld [vmem:[#allocation5 + $0x934] ss:$8 sps:$4 sm:$0xff]   ;;  %v5259_v9 = vld [vmem:[#allocation5 + $0x830] ss:$8 sps:$4 sm:$0xff]  }
 0x146   :  { %3532 = vmatpush2.bf16.msra.mxu0 %v5205_v10  ;;  %v5262_v10 = vld [vmem:[#allocation5 + $0x930] ss:$8 sps:$4 sm:$0xff]  }
 0x147   :  { %3573 = vmatpush2.bf16.msra.mxu1 %v5208_v11  ;;  %3533 = vmatprep.subr.bf16.mxu0 %v5213_v12  ;;  %v5267_v11 = vld [vmem:[#allocation5 + $0x824] ss:$8 sps:$4 sm:$0xff]  }
 0x148   :  { %3574 = vmatprep.subr.bf16.mxu1 %v5216_v13  ;;  %v5270_v12 = vld [vmem:[#allocation5 + $0x924] ss:$8 sps:$4 sm:$0xff]   ;;  %v5265_v13 = vld [vmem:[#allocation5 + $0x820] ss:$8 sps:$4 sm:$0xff]  }
 0x14a   :  { %3534 = vmatpush2.bf16.msra.mxu0 %v5211_v14  ;;  %v5268_v14 = vld [vmem:[#allocation5 + $0x920] ss:$8 sps:$4 sm:$0xff]  }
 0x14b   :  { %3575 = vmatpush2.bf16.msra.mxu1 %v5214_v15  ;;  %3535 = vmatprep.subr.bf16.mxu0 %v5219_v16  ;;  %v5273_v15 = vld [vmem:[#allocation5 + $0x814] ss:$8 sps:$4 sm:$0xff]  }
 0x14c   :  { %3576 = vmatprep.subr.bf16.mxu1 %v5222_v17  ;;  %v5276_v16 = vld [vmem:[#allocation5 + $0x914] ss:$8 sps:$4 sm:$0xff]   ;;  %v5271_v17 = vld [vmem:[#allocation5 + $0x810] ss:$8 sps:$4 sm:$0xff]  }
 0x14e   :  { %3536 = vmatpush2.bf16.msra.mxu0 %v5217_v18  ;;  %v5274_v18 = vld [vmem:[#allocation5 + $0x910] ss:$8 sps:$4 sm:$0xff]  }
 0x14f   :  { %3577 = vmatpush2.bf16.msra.mxu1 %v5220_v19  ;;  %3537 = vmatprep.subr.bf16.mxu0 %v5225_v21  ;;  %v5279_v19 = vld [vmem:[#allocation5 + $0x804] ss:$8 sps:$4 sm:$0xff]   ;;  %v5277_v21 = vld [vmem:[#allocation5 + $0x800] ss:$8 sps:$4 sm:$0xff]  }
 0x150   :  { %3578 = vmatprep.subr.bf16.mxu1 %v5228_v22  ;;  %v5280_v22 = vld [vmem:[#allocation5 + $0x900] ss:$8 sps:$4 sm:$0xff]  }
 0x152   :  { %3538 = vmatpush2.bf16.msra.mxu0 %v5223_v23  ;;  %v5285_v23 = vld [vmem:[#allocation5 + $0x8f4] ss:$8 sps:$4 sm:$0xff]  }
 0x153   :  { %3579 = vmatpush2.bf16.msra.mxu1 %v5226_v24  ;;  %3539 = vmatprep.subr.bf16.mxu0 %v5231_v26  ;;  %v5288_v24 = vld [vmem:[#allocation5 + $0x9f4] ss:$8 sps:$4 sm:$0xff]   ;;  %v5286_v26 = vld [vmem:[#allocation5 + $0x9f0] ss:$8 sps:$4 sm:$0xff]  }
 0x154   :  { %3580 = vmatprep.subr.bf16.mxu1 %v5234_v27  ;;  %v5291_v27 = vld [vmem:[#allocation5 + $0x8e4] ss:$8 sps:$4 sm:$0xff]  }
 0x156   :  { %3540 = vmatpush2.bf16.msra.mxu0 %v5229_v28  ;;  %v5294_v28 = vld [vmem:[#allocation5 + $0x9e4] ss:$8 sps:$4 sm:$0xff]  }
 0x157   :  { %3581 = vmatpush2.bf16.msra.mxu1 %v5232_v29  ;;  %3591 = vmatprep.subr.bf16.mxu0 %v5237_v34  ;;  %v5289_v29 = vld [vmem:[#allocation5 + $0x8e0] ss:$8 sps:$4 sm:$0xff]   ;;  %v5298_v34 = vld [vmem:[#allocation5 + $0x9d0] ss:$8 sps:$4 sm:$0xff]  }
 0x158   :  { %3632 = vmatprep.subr.bf16.mxu1 %v5240_v35  ;;  %v5303_v35 = vld [vmem:[#allocation5 + $0x8c4] ss:$8 sps:$4 sm:$0xff]  }
 0x159   :  { %v3297_v49 = vpop.f32.mrf.mxu0  ;;  %3542 = vmatmul.mubr.bf16.vlgmr.msra.gmra.mxu0 %v159_v39  ;;  %v5309_v39 = vld [vmem:[#allocation5 + $0x8b4] ss:$8 sps:$4 sm:$0xff]  }
 0x15a   :  { %v3338_v50 = vpop.f32.mrf.mxu1  ;;  %3583 = vmatmul.mubr.bf16.vlgmr.msra.gmra.mxu1 %v161_v40  ;;  %v3298_v52 = vadd.f32 %v3297_v49, %v696_v42  ;;  %3592 = vmatpush1.bf16.msra.mxu0 %v5235_v36  ;;  %v5306_v36 = vld [vmem:[#allocation5 + $0x9c4] ss:$8 sps:$4 sm:$0xff]   ;;  %v5312_v40 = vld [vmem:[#allocation5 + $0x9b4] ss:$8 sps:$4 sm:$0xff]   ;;  %v5310_v42 = vld [vmem:[#allocation5 + $0x9b0] ss:$8 sps:$4 sm:$0xff]  }
 0x15b   :  { %3633 = vmatpush1.bf16.msra.mxu1 %v5238_v43  ;;  %v3299_v54 = vpop.f32.mrf.mxu0  ;;  %3593 = vmatprep.subr.bf16.mxu0 %v5243_v44  ;;  %v5315_v43 = vld [vmem:[#allocation5 + $0x8a4] ss:$8 sps:$4 sm:$0xff]   ;;  %v5319_v49 = vld [vmem:[#allocation5 + $0x890] ss:$8 sps:$4 sm:$0xff]  }
 0x15c   :  { %v3340_v55 = vpop.f32.mrf.mxu1  ;;  %3634 = vmatprep.subr.bf16.mxu1 %v5246_v45  ;;  %v5892_v58 = vadd.f32 %v3338_v50, %v3298_v52  ;;  %v3300_v59 = vadd.f32 %v3299_v54, %v700_v46  ;;  %3623 = vmatprep.mubr.bf16.mxu0 %v164_v47  ;;  %v5318_v44 = vld [vmem:[#allocation5 + $0x9a4] ss:$8 sps:$4 sm:$0xff]   ;;  %v5313_v45 = vld [vmem:[#allocation5 + $0x8a0] ss:$8 sps:$4 sm:$0xff]   ;;  %v5321_v47 = vld [vmem:[#allocation5 + $0x894] ss:$8 sps:$4 sm:$0xff]  }
 0x15d   :  { %3664 = vmatprep.mubr.bf16.mxu1 %v166_v48  ;;  %v3301_v60 = vpop.f32.mrf.mxu0  ;;  %v5316_v46 = vld [vmem:[#allocation5 + $0x9a0] ss:$8 sps:$4 sm:$0xff]   ;;  %v5324_v48 = vld [vmem:[#allocation5 + $0x994] ss:$8 sps:$4 sm:$0xff]   ;;  %v5322_v50 = vld [vmem:[#allocation5 + $0x990] ss:$8 sps:$4 sm:$0xff]  }
 0x15e   :  { %v3342_v61 = vpop.f32.mrf.mxu1  ;;  %v5894_v63 = vadd.f32 %v3340_v55, %v3300_v59  ;;  %3594 = vmatpush1.bf16.msra.mxu0 %v5241_v51  ;;  %v5327_v51 = vld [vmem:[#allocation5 + $0x884] ss:$8 sps:$4 sm:$0xff]   ;;  %v5328_v54 = vld [vmem:[#allocation5 + $0x980] ss:$8 sps:$4 sm:$0xff]   ;;  %v5336_v59 = vld [vmem:[#allocation5 + $0xb74] ss:$8 sps:$4 sm:$0xff]  }
 0x15f   :  { %3635 = vmatpush1.bf16.msra.mxu1 %v5244_v53  ;;  %v3302_v1 = vpop.f32.mrf.mxu0  ;;  %3595 = vmatprep.subr.bf16.mxu0 %v5249_v56  ;;  %v5330_v52 = vld [vmem:[#allocation5 + $0x984] ss:$8 sps:$4 sm:$0xff]   ;;  %v5325_v53 = vld [vmem:[#allocation5 + $0x880] ss:$8 sps:$4 sm:$0xff]   ;;  %v133_v56 = vld [vmem:[#allocation2 + $0x90] sm:$0xff] }
 0x160   :  { %v3343_v2 = vpop.f32.mrf.mxu1  ;;  %3636 = vmatprep.subr.bf16.mxu1 %v5252_v57  ;;  %v131_v55 = vld [vmem:[#allocation2 + $0x80] sm:$0xff]  ;;  %v5333_v57 = vld [vmem:[#allocation5 + $0xa74] ss:$8 sps:$4 sm:$0xff]   ;;  %v165_v61 = vpack.c.bf16 %v133_v56, %v133_v56  ;;  %v5331_v1 = vld [vmem:[#allocation5 + $0xa70] ss:$8 sps:$4 sm:$0xff]  }
 0x161   :  { %v163_v60 = vpack.c.bf16 %v131_v55, %v131_v55  ;;  %v5334_v2 = vld [vmem:[#allocation5 + $0xb70] ss:$8 sps:$4 sm:$0xff]   ;;  %v5399_v55 = vld [vmem:[#allocation5 + $0xac4] ss:$8 sps:$4 sm:$0xff]  }
 0x162   :  { %3596 = vmatpush1.bf16.msra.mxu0 %v5247_v62  ;;  %v136_v62 = vld [vmem:[#allocation2 + $0xa8] sm:$0xff] }
 0x163   :  { %3637 = vmatpush1.bf16.msra.mxu1 %v5250_v0  ;;  %3597 = vmatprep.subr.bf16.mxu0 %v5255_v3  ;;  %v138_v0 = vld [vmem:[#allocation2 + $0xb8] sm:$0xff]  ;;  %v5339_v3 = vld [vmem:[#allocation5 + $0xa64] ss:$8 sps:$4 sm:$0xff]  }
 0x164   :  { %3638 = vmatprep.subr.bf16.mxu1 %v5258_v4  ;;  %v5342_v4 = vld [vmem:[#allocation5 + $0xb64] ss:$8 sps:$4 sm:$0xff]  }
 0x165   :  { %v5402_v56 = vld [vmem:[#allocation5 + $0xbc4] ss:$8 sps:$4 sm:$0xff]  }
 0x166   :  { %3598 = vmatpush1.bf16.msra.mxu0 %v5253_v5  ;;  %v5337_v5 = vld [vmem:[#allocation5 + $0xa60] ss:$8 sps:$4 sm:$0xff]  }
 0x167   :  { %3639 = vmatpush1.bf16.msra.mxu1 %v5256_v6  ;;  %3599 = vmatprep.subr.bf16.mxu0 %v5261_v7  ;;  %v5340_v6 = vld [vmem:[#allocation5 + $0xb60] ss:$8 sps:$4 sm:$0xff]   ;;  %v168_v7 = vpack.c.bf16 %v136_v62, %v136_v62  ;;  %v5403_v62 = vld [vmem:[#allocation5 + $0xab0] ss:$8 sps:$4 sm:$0xff]  }
 0x168   :  { %3640 = vmatprep.subr.bf16.mxu1 %v5264_v8  ;;  %v170_v8 = vpack.c.bf16 %v138_v0, %v138_v0  ;;  %v5406_v0 = vld [vmem:[#allocation5 + $0xbb0] ss:$8 sps:$4 sm:$0xff]  }
 0x16a   :  { %3600 = vmatpush1.bf16.msra.mxu0 %v5259_v9 }
 0x16b   :  { %3641 = vmatpush1.bf16.msra.mxu1 %v5262_v10  ;;  %3601 = vmatprep.subr.bf16.mxu0 %v5267_v11 }
 0x16c   :  { %3642 = vmatprep.subr.bf16.mxu1 %v5270_v12 }
 0x16e   :  { %3602 = vmatpush1.bf16.msra.mxu0 %v5265_v13 }
 0x16f   :  { %3643 = vmatpush1.bf16.msra.mxu1 %v5268_v14  ;;  %3603 = vmatprep.subr.bf16.mxu0 %v5273_v15  ;;  %v5345_v14 = vld [vmem:[#allocation5 + $0xa54] ss:$8 sps:$4 sm:$0xff]  }
 0x170   :  { %3644 = vmatprep.subr.bf16.mxu1 %v5276_v16  ;;  %v5348_v15 = vld [vmem:[#allocation5 + $0xb54] ss:$8 sps:$4 sm:$0xff]  }
 0x172   :  { %3604 = vmatpush1.bf16.msra.mxu0 %v5271_v17 }
 0x173   :  { %3645 = vmatpush1.bf16.msra.mxu1 %v5274_v18  ;;  %3605 = vmatprep.subr.bf16.mxu0 %v5279_v19  ;;  %v5343_v18 = vld [vmem:[#allocation5 + $0xa50] ss:$8 sps:$4 sm:$0xff]  }
 0x174   :  { %3646 = vmatprep.subr.bf16.mxu1 %v5282_v20  ;;  %v5346_v19 = vld [vmem:[#allocation5 + $0xb50] ss:$8 sps:$4 sm:$0xff]  }
 0x176   :  { %3606 = vmatpush1.bf16.msra.mxu0 %v5277_v21 }
 0x177   :  { %3647 = vmatpush1.bf16.msra.mxu1 %v5280_v22  ;;  %3607 = vmatprep.subr.bf16.mxu0 %v5285_v23 }
 0x178   :  { %3648 = vmatprep.subr.bf16.mxu1 %v5288_v24  ;;  %v5351_v24 = vld [vmem:[#allocation5 + $0xa44] ss:$8 sps:$4 sm:$0xff]  }
 0x17a   :  { %3608 = vmatpush2.bf16.msra.mxu0 %v5283_v25  ;;  %v5354_v25 = vld [vmem:[#allocation5 + $0xb44] ss:$8 sps:$4 sm:$0xff]  }
 0x17b   :  { %3649 = vmatpush2.bf16.msra.mxu1 %v5286_v26  ;;  %3609 = vmatprep.subr.bf16.mxu0 %v5291_v27  ;;  %v5349_v26 = vld [vmem:[#allocation5 + $0xa40] ss:$8 sps:$4 sm:$0xff]   ;;  %v5357_v27 = vld [vmem:[#allocation5 + $0xa34] ss:$8 sps:$4 sm:$0xff]  }
 0x17c   :  { %3650 = vmatprep.subr.bf16.mxu1 %v5294_v28  ;;  %v5360_v28 = vld [vmem:[#allocation5 + $0xb34] ss:$8 sps:$4 sm:$0xff]  }
 0x17e   :  { %3610 = vmatpush2.bf16.msra.mxu0 %v5289_v29  ;;  %v5355_v29 = vld [vmem:[#allocation5 + $0xa30] ss:$8 sps:$4 sm:$0xff]  }
 0x17f   :  { %3651 = vmatpush2.bf16.msra.mxu1 %v5292_v30  ;;  %3611 = vmatprep.subr.bf16.mxu0 %v5297_v31  ;;  %v5358_v30 = vld [vmem:[#allocation5 + $0xb30] ss:$8 sps:$4 sm:$0xff]   ;;  %v5363_v31 = vld [vmem:[#allocation5 + $0xa24] ss:$8 sps:$4 sm:$0xff]  }
 0x180   :  { %3652 = vmatprep.subr.bf16.mxu1 %v5300_v32  ;;  %v5366_v32 = vld [vmem:[#allocation5 + $0xb24] ss:$8 sps:$4 sm:$0xff]  }
 0x182   :  { %3612 = vmatpush2.bf16.msra.mxu0 %v5295_v33  ;;  %v5361_v33 = vld [vmem:[#allocation5 + $0xa20] ss:$8 sps:$4 sm:$0xff]  }
 0x183   :  { %3653 = vmatpush2.bf16.msra.mxu1 %v5298_v34  ;;  %3613 = vmatprep.subr.bf16.mxu0 %v5303_v35  ;;  %v5364_v34 = vld [vmem:[#allocation5 + $0xb20] ss:$8 sps:$4 sm:$0xff]   ;;  %v5369_v35 = vld [vmem:[#allocation5 + $0xa14] ss:$8 sps:$4 sm:$0xff]  }
 0x184   :  { %3654 = vmatprep.subr.bf16.mxu1 %v5306_v36  ;;  %v5372_v36 = vld [vmem:[#allocation5 + $0xb14] ss:$8 sps:$4 sm:$0xff]  }
 0x186   :  { %3614 = vmatpush2.bf16.msra.mxu0 %v5301_v37  ;;  %v5367_v37 = vld [vmem:[#allocation5 + $0xa10] ss:$8 sps:$4 sm:$0xff]  }
 0x187   :  { %3655 = vmatpush2.bf16.msra.mxu1 %v5304_v38  ;;  %3615 = vmatprep.subr.bf16.mxu0 %v5309_v39  ;;  %v5370_v38 = vld [vmem:[#allocation5 + $0xb10] ss:$8 sps:$4 sm:$0xff]   ;;  %v5375_v39 = vld [vmem:[#allocation5 + $0xa04] ss:$8 sps:$4 sm:$0xff]  }
 0x188   :  { %3656 = vmatprep.subr.bf16.mxu1 %v5312_v40  ;;  %v5378_v40 = vld [vmem:[#allocation5 + $0xb04] ss:$8 sps:$4 sm:$0xff]  }
 0x18a   :  { %3616 = vmatpush2.bf16.msra.mxu0 %v5307_v41  ;;  %v5373_v41 = vld [vmem:[#allocation5 + $0xa00] ss:$8 sps:$4 sm:$0xff]  }
 0x18b   :  { %3657 = vmatpush2.bf16.msra.mxu1 %v5310_v42  ;;  %3617 = vmatprep.subr.bf16.mxu0 %v5315_v43  ;;  %v5376_v42 = vld [vmem:[#allocation5 + $0xb00] ss:$8 sps:$4 sm:$0xff]   ;;  %v5381_v43 = vld [vmem:[#allocation5 + $0xaf4] ss:$8 sps:$4 sm:$0xff]  }
 0x18c   :  { %3658 = vmatprep.subr.bf16.mxu1 %v5318_v44  ;;  %v5384_v44 = vld [vmem:[#allocation5 + $0xbf4] ss:$8 sps:$4 sm:$0xff]  }
 0x18e   :  { %3618 = vmatpush2.bf16.msra.mxu0 %v5313_v45  ;;  %v5379_v45 = vld [vmem:[#allocation5 + $0xaf0] ss:$8 sps:$4 sm:$0xff]  }
 0x18f   :  { %3659 = vmatpush2.bf16.msra.mxu1 %v5316_v46  ;;  %3619 = vmatprep.subr.bf16.mxu0 %v5321_v47  ;;  %v5382_v46 = vld [vmem:[#allocation5 + $0xbf0] ss:$8 sps:$4 sm:$0xff]   ;;  %v5387_v47 = vld [vmem:[#allocation5 + $0xae4] ss:$8 sps:$4 sm:$0xff]  }
 0x190   :  { %3660 = vmatprep.subr.bf16.mxu1 %v5324_v48  ;;  %v5390_v48 = vld [vmem:[#allocation5 + $0xbe4] ss:$8 sps:$4 sm:$0xff]  }
 0x192   :  { %3620 = vmatpush2.bf16.msra.mxu0 %v5319_v49  ;;  %v5385_v49 = vld [vmem:[#allocation5 + $0xae0] ss:$8 sps:$4 sm:$0xff]  }
 0x193   :  { %3661 = vmatpush2.bf16.msra.mxu1 %v5322_v50  ;;  %3621 = vmatprep.subr.bf16.mxu0 %v5327_v51  ;;  %v5388_v50 = vld [vmem:[#allocation5 + $0xbe0] ss:$8 sps:$4 sm:$0xff]   ;;  %v5393_v51 = vld [vmem:[#allocation5 + $0xad4] ss:$8 sps:$4 sm:$0xff]  }
 0x194   :  { %3662 = vmatprep.subr.bf16.mxu1 %v5330_v52  ;;  %v5396_v52 = vld [vmem:[#allocation5 + $0xbd4] ss:$8 sps:$4 sm:$0xff]  }
 0x196   :  { %3622 = vmatpush2.bf16.msra.mxu0 %v5325_v53  ;;  %v5391_v53 = vld [vmem:[#allocation5 + $0xad0] ss:$8 sps:$4 sm:$0xff]  }
 0x197   :  { %3663 = vmatpush2.bf16.msra.mxu1 %v5328_v54  ;;  %3673 = vmatprep.subr.bf16.mxu0 %v5333_v57  ;;  %v5394_v54 = vld [vmem:[#allocation5 + $0xbd0] ss:$8 sps:$4 sm:$0xff]   ;;  %v5397_v57 = vld [vmem:[#allocation5 + $0xac0] ss:$8 sps:$4 sm:$0xff]  }
 0x198   :  { %3714 = vmatprep.subr.bf16.mxu1 %v5336_v59  ;;  %v5400_v59 = vld [vmem:[#allocation5 + $0xbc0] ss:$8 sps:$4 sm:$0xff]  }
 0x199   :  { %v3379_v9 = vpop.f32.mrf.mxu0  ;;  %3624 = vmatmul.mubr.bf16.vlgmr.msra.gmra.mxu0 %v163_v60  ;;  %v5405_v60 = vld [vmem:[#allocation5 + $0xab4] ss:$8 sps:$4 sm:$0xff]  }
 0x19a   :  { %v3420_v10 = vpop.f32.mrf.mxu1  ;;  %3665 = vmatmul.mubr.bf16.vlgmr.msra.gmra.mxu1 %v165_v61  ;;  %v3380_v11 = vadd.f32 %v3379_v9, %v5892_v58  ;;  %3674 = vmatpush1.bf16.msra.mxu0 %v5331_v1  ;;  %v5408_v61 = vld [vmem:[#allocation5 + $0xbb4] ss:$8 sps:$4 sm:$0xff]   ;;  %v5411_v1 = vld [vmem:[#allocation5 + $0xaa4] ss:$8 sps:$4 sm:$0xff]  }
 0x19b   :  { %3715 = vmatpush1.bf16.msra.mxu1 %v5334_v2  ;;  %v3381_v12 = vpop.f32.mrf.mxu0  ;;  %3675 = vmatprep.subr.bf16.mxu0 %v5339_v3  ;;  %v5414_v2 = vld [vmem:[#allocation5 + $0xba4] ss:$8 sps:$4 sm:$0xff]   ;;  %v5409_v3 = vld [vmem:[#allocation5 + $0xaa0] ss:$8 sps:$4 sm:$0xff]  }
 0x19c   :  { %v3422_v13 = vpop.f32.mrf.mxu1  ;;  %3716 = vmatprep.subr.bf16.mxu1 %v5342_v4  ;;  %v5897_v16 = vadd.f32 %v3420_v10, %v3380_v11  ;;  %v3382_v17 = vadd.f32 %v3381_v12, %v5894_v63  ;;  %3705 = vmatprep.mubr.bf16.mxu0 %v168_v7  ;;  %v5352_v63 = vld [vmem:[#allocation5 + $0xb40] ss:$8 sps:$4 sm:$0xff]   ;;  %v5415_v7 = vld [vmem:[#allocation5 + $0xa90] ss:$8 sps:$4 sm:$0xff]   ;;  %v5423_v9 = vld [vmem:[#allocation5 + $0xa84] ss:$8 sps:$4 sm:$0xff]  }
 0x19d   :  { %3746 = vmatprep.mubr.bf16.mxu1 %v170_v8  ;;  %v3383_v20 = vpop.f32.mrf.mxu0  ;;  %v5412_v4 = vld [vmem:[#allocation5 + $0xba0] ss:$8 sps:$4 sm:$0xff]   ;;  %v5418_v8 = vld [vmem:[#allocation5 + $0xb90] ss:$8 sps:$4 sm:$0xff]   ;;  %v5426_v10 = vld [vmem:[#allocation5 + $0xb84] ss:$8 sps:$4 sm:$0xff]  }
 0x19e   :  { %v3424_v21 = vpop.f32.mrf.mxu1  ;;  %v5900_v22 = vadd.f32 %v3422_v13, %v3382_v17  ;;  %3676 = vmatpush1.bf16.msra.mxu0 %v5337_v5  ;;  %v5417_v5 = vld [vmem:[#allocation5 + $0xa94] ss:$8 sps:$4 sm:$0xff]   ;;  %v5421_v11 = vld [vmem:[#allocation5 + $0xa80] ss:$8 sps:$4 sm:$0xff]  }
 0x19f   :  { %3717 = vmatpush1.bf16.msra.mxu1 %v5340_v6  ;;  %v3384_v58 = vpop.f32.mrf.mxu0  ;;  %3677 = vmatprep.subr.bf16.mxu0 %v5345_v14  ;;  %v5420_v6 = vld [vmem:[#allocation5 + $0xb94] ss:$8 sps:$4 sm:$0xff]   ;;  %v5424_v12 = vld [vmem:[#allocation5 + $0xb80] ss:$8 sps:$4 sm:$0xff]  }
 0x1a0   :  { %v3425_v23 = vpop.f32.mrf.mxu1  ;;  %3718 = vmatprep.subr.bf16.mxu1 %v5348_v15  ;;  %v135_v13 = vld [vmem:[#allocation2 + $0xa0] sm:$0xff]  ;;  %v137_v14 = vld [vmem:[#allocation2 + $0xb0] sm:$0xff]  ;;  %v140_v20 = vld [vmem:[#allocation2 + $0xc8] sm:$0xff] }
 0x1a1   :  { %v5429_v15 = vld [vmem:[#allocation5 + $0xc74] ss:$8 sps:$4 sm:$0xff]   ;;  %v5427_v58 = vld [vmem:[#allocation5 + $0xc70] ss:$8 sps:$4 sm:$0xff]  }
 0x1a2   :  { %3678 = vmatpush1.bf16.msra.mxu0 %v5343_v18  ;;  %v5432_v17 = vld [vmem:[#allocation5 + $0xd74] ss:$8 sps:$4 sm:$0xff]   ;;  %v167_v18 = vpack.c.bf16 %v135_v13, %v135_v13  ;;  %v5430_v23 = vld [vmem:[#allocation5 + $0xd70] ss:$8 sps:$4 sm:$0xff]   ;;  %v5495_v13 = vld [vmem:[#allocation5 + $0xcc4] ss:$8 sps:$4 sm:$0xff]  }
 0x1a3   :  { %3719 = vmatpush1.bf16.msra.mxu1 %v5346_v19  ;;  %3679 = vmatprep.subr.bf16.mxu0 %v5351_v24  ;;  %v169_v19 = vpack.c.bf16 %v137_v14, %v137_v14  ;;  %v142_v21 = vld [vmem:[#allocation2 + $0xd8] sm:$0xff]  ;;  %v5435_v24 = vld [vmem:[#allocation5 + $0xc64] ss:$8 sps:$4 sm:$0xff]  }
 0x1a4   :  { %3720 = vmatprep.subr.bf16.mxu1 %v5354_v25  ;;  %v5438_v25 = vld [vmem:[#allocation5 + $0xd64] ss:$8 sps:$4 sm:$0xff]  }
 0x1a5   :  { %v5498_v14 = vld [vmem:[#allocation5 + $0xdc4] ss:$8 sps:$4 sm:$0xff]  }
 0x1a6   :  { %3680 = vmatpush1.bf16.msra.mxu0 %v5349_v26  ;;  %v172_v26 = vpack.c.bf16 %v140_v20, %v140_v20  ;;  %v5499_v20 = vld [vmem:[#allocation5 + $0xcb0] ss:$8 sps:$4 sm:$0xff]  }
 0x1a7   :  { %3721 = vmatpush1.bf16.msra.mxu1 %v5352_v63  ;;  %3681 = vmatprep.subr.bf16.mxu0 %v5357_v27  ;;  %v174_v63 = vpack.c.bf16 %v142_v21, %v142_v21  ;;  %v5502_v21 = vld [vmem:[#allocation5 + $0xdb0] ss:$8 sps:$4 sm:$0xff]  }
 0x1a8   :  { %3722 = vmatprep.subr.bf16.mxu1 %v5360_v28 }
 0x1aa   :  { %3682 = vmatpush1.bf16.msra.mxu0 %v5355_v29 }
 0x1ab   :  { %3723 = vmatpush1.bf16.msra.mxu1 %v5358_v30  ;;  %3683 = vmatprep.subr.bf16.mxu0 %v5363_v31  ;;  %v5433_v30 = vld [vmem:[#allocation5 + $0xc60] ss:$8 sps:$4 sm:$0xff]  }
 0x1ac   :  { %3724 = vmatprep.subr.bf16.mxu1 %v5366_v32  ;;  %v5436_v31 = vld [vmem:[#allocation5 + $0xd60] ss:$8 sps:$4 sm:$0xff]  }
 0x1ae   :  { %3684 = vmatpush1.bf16.msra.mxu0 %v5361_v33 }
 0x1af   :  { %3725 = vmatpush1.bf16.msra.mxu1 %v5364_v34  ;;  %3685 = vmatprep.subr.bf16.mxu0 %v5369_v35  ;;  %v5441_v34 = vld [vmem:[#allocation5 + $0xc54] ss:$8 sps:$4 sm:$0xff]  }
 0x1b0   :  { %3726 = vmatprep.subr.bf16.mxu1 %v5372_v36  ;;  %v5444_v35 = vld [vmem:[#allocation5 + $0xd54] ss:$8 sps:$4 sm:$0xff]  }
 0x1b2   :  { %3686 = vmatpush1.bf16.msra.mxu0 %v5367_v37 }
 0x1b3   :  { %3727 = vmatpush1.bf16.msra.mxu1 %v5370_v38  ;;  %3687 = vmatprep.subr.bf16.mxu0 %v5375_v39 }
 0x1b4   :  { %3728 = vmatprep.subr.bf16.mxu1 %v5378_v40 }
 0x1b6   :  { %3688 = vmatpush1.bf16.msra.mxu0 %v5373_v41  ;;  %v5442_v41 = vld [vmem:[#allocation5 + $0xd50] ss:$8 sps:$4 sm:$0xff]  }
 0x1b7   :  { %3729 = vmatpush1.bf16.msra.mxu1 %v5376_v42  ;;  %3689 = vmatprep.subr.bf16.mxu0 %v5381_v43 }
 0x1b8   :  { %3730 = vmatprep.subr.bf16.mxu1 %v5384_v44  ;;  %v5447_v44 = vld [vmem:[#allocation5 + $0xc44] ss:$8 sps:$4 sm:$0xff]  }
 0x1ba   :  { %3690 = vmatpush2.bf16.msra.mxu0 %v5379_v45  ;;  %v5450_v45 = vld [vmem:[#allocation5 + $0xd44] ss:$8 sps:$4 sm:$0xff]  }
 0x1bb   :  { %3731 = vmatpush2.bf16.msra.mxu1 %v5382_v46  ;;  %3691 = vmatprep.subr.bf16.mxu0 %v5387_v47  ;;  %v5445_v46 = vld [vmem:[#allocation5 + $0xc40] ss:$8 sps:$4 sm:$0xff]   ;;  %v5453_v47 = vld [vmem:[#allocation5 + $0xc34] ss:$8 sps:$4 sm:$0xff]  }
 0x1bc   :  { %3732 = vmatprep.subr.bf16.mxu1 %v5390_v48  ;;  %v5456_v48 = vld [vmem:[#allocation5 + $0xd34] ss:$8 sps:$4 sm:$0xff]  }
 0x1be   :  { %3692 = vmatpush2.bf16.msra.mxu0 %v5385_v49  ;;  %v5451_v49 = vld [vmem:[#allocation5 + $0xc30] ss:$8 sps:$4 sm:$0xff]  }
 0x1bf   :  { %3733 = vmatpush2.bf16.msra.mxu1 %v5388_v50  ;;  %3693 = vmatprep.subr.bf16.mxu0 %v5393_v51  ;;  %v5454_v50 = vld [vmem:[#allocation5 + $0xd30] ss:$8 sps:$4 sm:$0xff]   ;;  %v5459_v51 = vld [vmem:[#allocation5 + $0xc24] ss:$8 sps:$4 sm:$0xff]  }
 0x1c0   :  { %3734 = vmatprep.subr.bf16.mxu1 %v5396_v52  ;;  %v5462_v52 = vld [vmem:[#allocation5 + $0xd24] ss:$8 sps:$4 sm:$0xff]  }
 0x1c2   :  { %3694 = vmatpush2.bf16.msra.mxu0 %v5391_v53  ;;  %v5457_v53 = vld [vmem:[#allocation5 + $0xc20] ss:$8 sps:$4 sm:$0xff]  }
 0x1c3   :  { %3735 = vmatpush2.bf16.msra.mxu1 %v5394_v54  ;;  %3695 = vmatprep.subr.bf16.mxu0 %v5399_v55  ;;  %v5460_v54 = vld [vmem:[#allocation5 + $0xd20] ss:$8 sps:$4 sm:$0xff]   ;;  %v5465_v55 = vld [vmem:[#allocation5 + $0xc14] ss:$8 sps:$4 sm:$0xff]  }
 0x1c4   :  { %3736 = vmatprep.subr.bf16.mxu1 %v5402_v56  ;;  %v5468_v56 = vld [vmem:[#allocation5 + $0xd14] ss:$8 sps:$4 sm:$0xff]  }
 0x1c6   :  { %3696 = vmatpush2.bf16.msra.mxu0 %v5397_v57  ;;  %v5463_v57 = vld [vmem:[#allocation5 + $0xc10] ss:$8 sps:$4 sm:$0xff]  }
 0x1c7   :  { %3737 = vmatpush2.bf16.msra.mxu1 %v5400_v59  ;;  %3697 = vmatprep.subr.bf16.mxu0 %v5405_v60  ;;  %v5466_v59 = vld [vmem:[#allocation5 + $0xd10] ss:$8 sps:$4 sm:$0xff]   ;;  %v5471_v60 = vld [vmem:[#allocation5 + $0xc04] ss:$8 sps:$4 sm:$0xff]  }
 0x1c8   :  { %3738 = vmatprep.subr.bf16.mxu1 %v5408_v61  ;;  %v5474_v61 = vld [vmem:[#allocation5 + $0xd04] ss:$8 sps:$4 sm:$0xff]  }
 0x1ca   :  { %3698 = vmatpush2.bf16.msra.mxu0 %v5403_v62  ;;  %v5469_v62 = vld [vmem:[#allocation5 + $0xc00] ss:$8 sps:$4 sm:$0xff]  }
 0x1cb   :  { %3739 = vmatpush2.bf16.msra.mxu1 %v5406_v0  ;;  %3699 = vmatprep.subr.bf16.mxu0 %v5411_v1  ;;  %v5472_v0 = vld [vmem:[#allocation5 + $0xd00] ss:$8 sps:$4 sm:$0xff]   ;;  %v5477_v1 = vld [vmem:[#allocation5 + $0xcf4] ss:$8 sps:$4 sm:$0xff]  }
 0x1cc   :  { %3740 = vmatprep.subr.bf16.mxu1 %v5414_v2  ;;  %v5480_v2 = vld [vmem:[#allocation5 + $0xdf4] ss:$8 sps:$4 sm:$0xff]  }
 0x1ce   :  { %3700 = vmatpush2.bf16.msra.mxu0 %v5409_v3  ;;  %v5475_v3 = vld [vmem:[#allocation5 + $0xcf0] ss:$8 sps:$4 sm:$0xff]  }
 0x1cf   :  { %3741 = vmatpush2.bf16.msra.mxu1 %v5412_v4  ;;  %3701 = vmatprep.subr.bf16.mxu0 %v5417_v5  ;;  %v5478_v4 = vld [vmem:[#allocation5 + $0xdf0] ss:$8 sps:$4 sm:$0xff]   ;;  %v5483_v5 = vld [vmem:[#allocation5 + $0xce4] ss:$8 sps:$4 sm:$0xff]  }
 0x1d0   :  { %3742 = vmatprep.subr.bf16.mxu1 %v5420_v6  ;;  %v5486_v6 = vld [vmem:[#allocation5 + $0xde4] ss:$8 sps:$4 sm:$0xff]  }
 0x1d2   :  { %3702 = vmatpush2.bf16.msra.mxu0 %v5415_v7  ;;  %v5481_v7 = vld [vmem:[#allocation5 + $0xce0] ss:$8 sps:$4 sm:$0xff]  }
 0x1d3   :  { %3743 = vmatpush2.bf16.msra.mxu1 %v5418_v8  ;;  %3703 = vmatprep.subr.bf16.mxu0 %v5423_v9  ;;  %v5484_v8 = vld [vmem:[#allocation5 + $0xde0] ss:$8 sps:$4 sm:$0xff]   ;;  %v5489_v9 = vld [vmem:[#allocation5 + $0xcd4] ss:$8 sps:$4 sm:$0xff]  }
 0x1d4   :  { %3744 = vmatprep.subr.bf16.mxu1 %v5426_v10  ;;  %v5492_v10 = vld [vmem:[#allocation5 + $0xdd4] ss:$8 sps:$4 sm:$0xff]  }
 0x1d6   :  { %3704 = vmatpush2.bf16.msra.mxu0 %v5421_v11  ;;  %v5487_v11 = vld [vmem:[#allocation5 + $0xcd0] ss:$8 sps:$4 sm:$0xff]  }
 0x1d7   :  { %3745 = vmatpush2.bf16.msra.mxu1 %v5424_v12  ;;  %3755 = vmatprep.subr.bf16.mxu0 %v5429_v15  ;;  %v5490_v12 = vld [vmem:[#allocation5 + $0xdd0] ss:$8 sps:$4 sm:$0xff]   ;;  %v5493_v15 = vld [vmem:[#allocation5 + $0xcc0] ss:$8 sps:$4 sm:$0xff]  }
 0x1d8   :  { %3796 = vmatprep.subr.bf16.mxu1 %v5432_v17  ;;  %v5496_v17 = vld [vmem:[#allocation5 + $0xdc0] ss:$8 sps:$4 sm:$0xff]  }
 0x1d9   :  { %v3461_v27 = vpop.f32.mrf.mxu0  ;;  %3706 = vmatmul.mubr.bf16.vlgmr.msra.gmra.mxu0 %v167_v18  ;;  %v5501_v18 = vld [vmem:[#allocation5 + $0xcb4] ss:$8 sps:$4 sm:$0xff]  }
 0x1da   :  { %v3502_v28 = vpop.f32.mrf.mxu1  ;;  %3747 = vmatmul.mubr.bf16.vlgmr.msra.gmra.mxu1 %v169_v19  ;;  %v3462_v29 = vadd.f32 %v3461_v27, %v5897_v16  ;;  %3756 = vmatpush1.bf16.msra.mxu0 %v5427_v58  ;;  %v5439_v16 = vld [vmem:[#allocation5 + $0xc50] ss:$8 sps:$4 sm:$0xff]   ;;  %v5504_v19 = vld [vmem:[#allocation5 + $0xdb4] ss:$8 sps:$4 sm:$0xff]   ;;  %v5507_v58 = vld [vmem:[#allocation5 + $0xca4] ss:$8 sps:$4 sm:$0xff]  }
 0x1db   :  { %3797 = vmatpush1.bf16.msra.mxu1 %v5430_v23  ;;  %v3463_v32 = vpop.f32.mrf.mxu0  ;;  %3757 = vmatprep.subr.bf16.mxu0 %v5435_v24  ;;  %v5510_v23 = vld [vmem:[#allocation5 + $0xda4] ss:$8 sps:$4 sm:$0xff]   ;;  %v5505_v24 = vld [vmem:[#allocation5 + $0xca0] ss:$8 sps:$4 sm:$0xff]   ;;  %v5511_v27 = vld [vmem:[#allocation5 + $0xc90] ss:$8 sps:$4 sm:$0xff]  }
 0x1dc   :  { %v3504_v33 = vpop.f32.mrf.mxu1  ;;  %3798 = vmatprep.subr.bf16.mxu1 %v5438_v25  ;;  %v5903_v36 = vadd.f32 %v3502_v28, %v3462_v29  ;;  %v3464_v37 = vadd.f32 %v3463_v32, %v5900_v22  ;;  %3787 = vmatprep.mubr.bf16.mxu0 %v172_v26  ;;  %v5448_v22 = vld [vmem:[#allocation5 + $0xd40] ss:$8 sps:$4 sm:$0xff]   ;;  %v5513_v26 = vld [vmem:[#allocation5 + $0xc94] ss:$8 sps:$4 sm:$0xff]   ;;  %v5514_v28 = vld [vmem:[#allocation5 + $0xd90] ss:$8 sps:$4 sm:$0xff]  }
 0x1dd   :  { %3828 = vmatprep.mubr.bf16.mxu1 %v174_v63  ;;  %v3465_v38 = vpop.f32.mrf.mxu0  ;;  %v5508_v25 = vld [vmem:[#allocation5 + $0xda0] ss:$8 sps:$4 sm:$0xff]   ;;  %v5516_v63 = vld [vmem:[#allocation5 + $0xd94] ss:$8 sps:$4 sm:$0xff]   ;;  %v5519_v29 = vld [vmem:[#allocation5 + $0xc84] ss:$8 sps:$4 sm:$0xff]  }
 0x1de   :  { %v3506_v39 = vpop.f32.mrf.mxu1  ;;  %v5906_v40 = vadd.f32 %v3504_v33, %v3464_v37  ;;  %3758 = vmatpush1.bf16.msra.mxu0 %v5433_v30  ;;  %v5522_v30 = vld [vmem:[#allocation5 + $0xd84] ss:$8 sps:$4 sm:$0xff]   ;;  %v5520_v32 = vld [vmem:[#allocation5 + $0xd80] ss:$8 sps:$4 sm:$0xff]   ;;  %v5528_v37 = vld [vmem:[#allocation5 + $0xf74] ss:$8 sps:$4 sm:$0xff]  }
 0x1df   :  { %3799 = vmatpush1.bf16.msra.mxu1 %v5436_v31  ;;  %v3466_v42 = vpop.f32.mrf.mxu0  ;;  %3759 = vmatprep.subr.bf16.mxu0 %v5441_v34  ;;  %v5517_v31 = vld [vmem:[#allocation5 + $0xc80] ss:$8 sps:$4 sm:$0xff]   ;;  %v141_v34 = vld [vmem:[#allocation2 + $0xd0] sm:$0xff] }
 0x1e0   :  { %v3507_v43 = vpop.f32.mrf.mxu1  ;;  %3800 = vmatprep.subr.bf16.mxu1 %v5444_v35  ;;  %v139_v33 = vld [vmem:[#allocation2 + $0xc0] sm:$0xff]  ;;  %v5525_v35 = vld [vmem:[#allocation5 + $0xe74] ss:$8 sps:$4 sm:$0xff]   ;;  %v173_v39 = vpack.c.bf16 %v141_v34, %v141_v34  ;;  %v5523_v42 = vld [vmem:[#allocation5 + $0xe70] ss:$8 sps:$4 sm:$0xff]  }
 0x1e1   :  { %v171_v38 = vpack.c.bf16 %v139_v33, %v139_v33  ;;  %v5526_v43 = vld [vmem:[#allocation5 + $0xf70] ss:$8 sps:$4 sm:$0xff]   ;;  %v5591_v33 = vld [vmem:[#allocation5 + $0xec4] ss:$8 sps:$4 sm:$0xff]  }
 0x1e2   :  { %3760 = vmatpush1.bf16.msra.mxu0 %v5439_v16  ;;  %v144_v16 = vld [vmem:[#allocation2 + $0xe8] sm:$0xff] }
 0x1e3   :  { %3801 = vmatpush1.bf16.msra.mxu1 %v5442_v41  ;;  %3761 = vmatprep.subr.bf16.mxu0 %v5447_v44  ;;  %v146_v41 = vld [vmem:[#allocation2 + $0xf8] sm:$0xff]  ;;  %v5531_v44 = vld [vmem:[#allocation5 + $0xe64] ss:$8 sps:$4 sm:$0xff]  }
 0x1e4   :  { %3802 = vmatprep.subr.bf16.mxu1 %v5450_v45  ;;  %v5534_v45 = vld [vmem:[#allocation5 + $0xf64] ss:$8 sps:$4 sm:$0xff]  }
 0x1e5   :  { %v5594_v34 = vld [vmem:[#allocation5 + $0xfc4] ss:$8 sps:$4 sm:$0xff]  }
 0x1e6   :  { %3762 = vmatpush1.bf16.msra.mxu0 %v5445_v46  ;;  %v176_v46 = vpack.c.bf16 %v144_v16, %v144_v16  ;;  %v5595_v16 = vld [vmem:[#allocation5 + $0xeb0] ss:$8 sps:$4 sm:$0xff]  }
 0x1e7   :  { %3803 = vmatpush1.bf16.msra.mxu1 %v5448_v22  ;;  %3763 = vmatprep.subr.bf16.mxu0 %v5453_v47  ;;  %v178_v22 = vpack.c.bf16 %v146_v41, %v146_v41  ;;  %v5598_v41 = vld [vmem:[#allocation5 + $0xfb0] ss:$8 sps:$4 sm:$0xff]  }
 0x1e8   :  { %3804 = vmatprep.subr.bf16.mxu1 %v5456_v48 }
 0x1ea   :  { %3764 = vmatpush1.bf16.msra.mxu0 %v5451_v49 }
 0x1eb   :  { %3805 = vmatpush1.bf16.msra.mxu1 %v5454_v50  ;;  %3765 = vmatprep.subr.bf16.mxu0 %v5459_v51  ;;  %v5529_v50 = vld [vmem:[#allocation5 + $0xe60] ss:$8 sps:$4 sm:$0xff]  }
 0x1ec   :  { %3806 = vmatprep.subr.bf16.mxu1 %v5462_v52  ;;  %v5532_v51 = vld [vmem:[#allocation5 + $0xf60] ss:$8 sps:$4 sm:$0xff]  }
 0x1ee   :  { %3766 = vmatpush1.bf16.msra.mxu0 %v5457_v53 }
 0x1ef   :  { %3807 = vmatpush1.bf16.msra.mxu1 %v5460_v54  ;;  %3767 = vmatprep.subr.bf16.mxu0 %v5465_v55  ;;  %v5537_v54 = vld [vmem:[#allocation5 + $0xe54] ss:$8 sps:$4 sm:$0xff]  }
 0x1f0   :  { %3808 = vmatprep.subr.bf16.mxu1 %v5468_v56  ;;  %v5540_v55 = vld [vmem:[#allocation5 + $0xf54] ss:$8 sps:$4 sm:$0xff]  }
 0x1f2   :  { %3768 = vmatpush1.bf16.msra.mxu0 %v5463_v57 }
 0x1f3   :  { %3809 = vmatpush1.bf16.msra.mxu1 %v5466_v59  ;;  %3769 = vmatprep.subr.bf16.mxu0 %v5471_v60 }
 0x1f4   :  { %3810 = vmatprep.subr.bf16.mxu1 %v5474_v61 }
 0x1f6   :  { %3770 = vmatpush1.bf16.msra.mxu0 %v5469_v62  ;;  %v5538_v62 = vld [vmem:[#allocation5 + $0xf50] ss:$8 sps:$4 sm:$0xff]  }
 0x1f7   :  { %3811 = vmatpush1.bf16.msra.mxu1 %v5472_v0  ;;  %3771 = vmatprep.subr.bf16.mxu0 %v5477_v1 }
 0x1f8   :  { %3812 = vmatprep.subr.bf16.mxu1 %v5480_v2  ;;  %v5543_v2 = vld [vmem:[#allocation5 + $0xe44] ss:$8 sps:$4 sm:$0xff]  }
 0x1fa   :  { %3772 = vmatpush2.bf16.msra.mxu0 %v5475_v3  ;;  %v5546_v3 = vld [vmem:[#allocation5 + $0xf44] ss:$8 sps:$4 sm:$0xff]  }
 0x1fb   :  { %3813 = vmatpush2.bf16.msra.mxu1 %v5478_v4  ;;  %3773 = vmatprep.subr.bf16.mxu0 %v5483_v5  ;;  %v5541_v4 = vld [vmem:[#allocation5 + $0xe40] ss:$8 sps:$4 sm:$0xff]   ;;  %v5549_v5 = vld [vmem:[#allocation5 + $0xe34] ss:$8 sps:$4 sm:$0xff]  }
 0x1fc   :  { %3814 = vmatprep.subr.bf16.mxu1 %v5486_v6  ;;  %v5552_v6 = vld [vmem:[#allocation5 + $0xf34] ss:$8 sps:$4 sm:$0xff]  }
 0x1fe   :  { %3774 = vmatpush2.bf16.msra.mxu0 %v5481_v7  ;;  %v5547_v7 = vld [vmem:[#allocation5 + $0xe30] ss:$8 sps:$4 sm:$0xff]  }
 0x1ff   :  { %3815 = vmatpush2.bf16.msra.mxu1 %v5484_v8  ;;  %3775 = vmatprep.subr.bf16.mxu0 %v5489_v9  ;;  %v5550_v8 = vld [vmem:[#allocation5 + $0xf30] ss:$8 sps:$4 sm:$0xff]   ;;  %v5555_v9 = vld [vmem:[#allocation5 + $0xe24] ss:$8 sps:$4 sm:$0xff]  }
 0x200   :  { %3816 = vmatprep.subr.bf16.mxu1 %v5492_v10  ;;  %v5558_v10 = vld [vmem:[#allocation5 + $0xf24] ss:$8 sps:$4 sm:$0xff]  }
 0x202   :  { %3776 = vmatpush2.bf16.msra.mxu0 %v5487_v11  ;;  %v5553_v11 = vld [vmem:[#allocation5 + $0xe20] ss:$8 sps:$4 sm:$0xff]  }
 0x203   :  { %3817 = vmatpush2.bf16.msra.mxu1 %v5490_v12  ;;  %3777 = vmatprep.subr.bf16.mxu0 %v5495_v13  ;;  %v5556_v12 = vld [vmem:[#allocation5 + $0xf20] ss:$8 sps:$4 sm:$0xff]   ;;  %v5561_v13 = vld [vmem:[#allocation5 + $0xe14] ss:$8 sps:$4 sm:$0xff]  }
 0x204   :  { %3818 = vmatprep.subr.bf16.mxu1 %v5498_v14  ;;  %v5564_v14 = vld [vmem:[#allocation5 + $0xf14] ss:$8 sps:$4 sm:$0xff]  }
 0x206   :  { %3778 = vmatpush2.bf16.msra.mxu0 %v5493_v15  ;;  %v5559_v15 = vld [vmem:[#allocation5 + $0xe10] ss:$8 sps:$4 sm:$0xff]  }
 0x207   :  { %3819 = vmatpush2.bf16.msra.mxu1 %v5496_v17  ;;  %3779 = vmatprep.subr.bf16.mxu0 %v5501_v18  ;;  %v5562_v17 = vld [vmem:[#allocation5 + $0xf10] ss:$8 sps:$4 sm:$0xff]   ;;  %v5567_v18 = vld [vmem:[#allocation5 + $0xe04] ss:$8 sps:$4 sm:$0xff]  }
 0x208   :  { %3820 = vmatprep.subr.bf16.mxu1 %v5504_v19  ;;  %v5570_v19 = vld [vmem:[#allocation5 + $0xf04] ss:$8 sps:$4 sm:$0xff]  }
 0x20a   :  { %3780 = vmatpush2.bf16.msra.mxu0 %v5499_v20  ;;  %v5565_v20 = vld [vmem:[#allocation5 + $0xe00] ss:$8 sps:$4 sm:$0xff]  }
 0x20b   :  { %3821 = vmatpush2.bf16.msra.mxu1 %v5502_v21  ;;  %3781 = vmatprep.subr.bf16.mxu0 %v5507_v58  ;;  %v5568_v21 = vld [vmem:[#allocation5 + $0xf00] ss:$8 sps:$4 sm:$0xff]   ;;  %v5573_v58 = vld [vmem:[#allocation5 + $0xef4] ss:$8 sps:$4 sm:$0xff]  }
 0x20c   :  { %3822 = vmatprep.subr.bf16.mxu1 %v5510_v23  ;;  %v5576_v23 = vld [vmem:[#allocation5 + $0xff4] ss:$8 sps:$4 sm:$0xff]  }
 0x20e   :  { %3782 = vmatpush2.bf16.msra.mxu0 %v5505_v24  ;;  %v5571_v24 = vld [vmem:[#allocation5 + $0xef0] ss:$8 sps:$4 sm:$0xff]  }
 0x20f   :  { %3823 = vmatpush2.bf16.msra.mxu1 %v5508_v25  ;;  %3783 = vmatprep.subr.bf16.mxu0 %v5513_v26  ;;  %v5574_v25 = vld [vmem:[#allocation5 + $0xff0] ss:$8 sps:$4 sm:$0xff]   ;;  %v5579_v26 = vld [vmem:[#allocation5 + $0xee4] ss:$8 sps:$4 sm:$0xff]  }
 0x210   :  { %3824 = vmatprep.subr.bf16.mxu1 %v5516_v63  ;;  %v5582_v63 = vld [vmem:[#allocation5 + $0xfe4] ss:$8 sps:$4 sm:$0xff]  }
 0x212   :  { %3784 = vmatpush2.bf16.msra.mxu0 %v5511_v27  ;;  %v5577_v27 = vld [vmem:[#allocation5 + $0xee0] ss:$8 sps:$4 sm:$0xff]  }
 0x213   :  { %3825 = vmatpush2.bf16.msra.mxu1 %v5514_v28  ;;  %3785 = vmatprep.subr.bf16.mxu0 %v5519_v29  ;;  %v5580_v28 = vld [vmem:[#allocation5 + $0xfe0] ss:$8 sps:$4 sm:$0xff]   ;;  %v5585_v29 = vld [vmem:[#allocation5 + $0xed4] ss:$8 sps:$4 sm:$0xff]  }
 0x214   :  { %3826 = vmatprep.subr.bf16.mxu1 %v5522_v30  ;;  %v5588_v30 = vld [vmem:[#allocation5 + $0xfd4] ss:$8 sps:$4 sm:$0xff]  }
 0x216   :  { %3786 = vmatpush2.bf16.msra.mxu0 %v5517_v31  ;;  %v5583_v31 = vld [vmem:[#allocation5 + $0xed0] ss:$8 sps:$4 sm:$0xff]  }
 0x217   :  { %3827 = vmatpush2.bf16.msra.mxu1 %v5520_v32  ;;  %3837 = vmatprep.subr.bf16.mxu0 %v5525_v35  ;;  %v5586_v32 = vld [vmem:[#allocation5 + $0xfd0] ss:$8 sps:$4 sm:$0xff]   ;;  %v5589_v35 = vld [vmem:[#allocation5 + $0xec0] ss:$8 sps:$4 sm:$0xff]  }
 0x218   :  { %3878 = vmatprep.subr.bf16.mxu1 %v5528_v37  ;;  %v5592_v37 = vld [vmem:[#allocation5 + $0xfc0] ss:$8 sps:$4 sm:$0xff]  }
 0x219   :  { %v3543_v47 = vpop.f32.mrf.mxu0  ;;  %3788 = vmatmul.mubr.bf16.vlgmr.msra.gmra.mxu0 %v171_v38  ;;  %v5597_v38 = vld [vmem:[#allocation5 + $0xeb4] ss:$8 sps:$4 sm:$0xff]  }
 0x21a   :  { %v3584_v48 = vpop.f32.mrf.mxu1  ;;  %3829 = vmatmul.mubr.bf16.vlgmr.msra.gmra.mxu1 %v173_v39  ;;  %v3544_v49 = vadd.f32 %v3543_v47, %v5903_v36  ;;  %3838 = vmatpush1.bf16.msra.mxu0 %v5523_v42  ;;  %v5535_v36 = vld [vmem:[#allocation5 + $0xe50] ss:$8 sps:$4 sm:$0xff]   ;;  %v5600_v39 = vld [vmem:[#allocation5 + $0xfb4] ss:$8 sps:$4 sm:$0xff]   ;;  %v5603_v42 = vld [vmem:[#allocation5 + $0xea4] ss:$8 sps:$4 sm:$0xff]  }
 0x21b   :  { %3879 = vmatpush1.bf16.msra.mxu1 %v5526_v43  ;;  %v3545_v52 = vpop.f32.mrf.mxu0  ;;  %3839 = vmatprep.subr.bf16.mxu0 %v5531_v44  ;;  %v5606_v43 = vld [vmem:[#allocation5 + $0xfa4] ss:$8 sps:$4 sm:$0xff]   ;;  %v5601_v44 = vld [vmem:[#allocation5 + $0xea0] ss:$8 sps:$4 sm:$0xff]   ;;  %v5607_v47 = vld [vmem:[#allocation5 + $0xe90] ss:$8 sps:$4 sm:$0xff]  }
 0x21c   :  { %v3586_v53 = vpop.f32.mrf.mxu1  ;;  %3880 = vmatprep.subr.bf16.mxu1 %v5534_v45  ;;  %v5909_v56 = vadd.f32 %v3584_v48, %v3544_v49  ;;  %v3546_v57 = vadd.f32 %v3545_v52, %v5906_v40  ;;  %3869 = vmatprep.mubr.bf16.mxu0 %v176_v46  ;;  %v5544_v40 = vld [vmem:[#allocation5 + $0xf40] ss:$8 sps:$4 sm:$0xff]   ;;  %v5609_v46 = vld [vmem:[#allocation5 + $0xe94] ss:$8 sps:$4 sm:$0xff]   ;;  %v5610_v48 = vld [vmem:[#allocation5 + $0xf90] ss:$8 sps:$4 sm:$0xff]  }
 0x21d   :  { %3910 = vmatprep.mubr.bf16.mxu1 %v178_v22  ;;  %v3547_v59 = vpop.f32.mrf.mxu0  ;;  %v5604_v45 = vld [vmem:[#allocation5 + $0xfa0] ss:$8 sps:$4 sm:$0xff]   ;;  %v5612_v22 = vld [vmem:[#allocation5 + $0xf94] ss:$8 sps:$4 sm:$0xff]   ;;  %v5615_v49 = vld [vmem:[#allocation5 + $0xe84] ss:$8 sps:$4 sm:$0xff]  }
 0x21e   :  { %v3588_v60 = vpop.f32.mrf.mxu1  ;;  %v5912_v61 = vadd.f32 %v3586_v53, %v3546_v57  ;;  %3840 = vmatpush1.bf16.msra.mxu0 %v5529_v50  ;;  %v5618_v50 = vld [vmem:[#allocation5 + $0xf84] ss:$8 sps:$4 sm:$0xff]   ;;  %v5616_v52 = vld [vmem:[#allocation5 + $0xf80] ss:$8 sps:$4 sm:$0xff]  }
 0x21f   :  { %3881 = vmatpush1.bf16.msra.mxu1 %v5532_v51  ;;  %v3548_v0 = vpop.f32.mrf.mxu0  ;;  %3841 = vmatprep.subr.bf16.mxu0 %v5537_v54  ;;  %v5613_v51 = vld [vmem:[#allocation5 + $0xe80] ss:$8 sps:$4 sm:$0xff]   ;;  %v145_v54 = vld [vmem:[#allocation2 + $0xf0] sm:$0xff] }
 0x220   :  { %v3589_v1 = vpop.f32.mrf.mxu1  ;;  %3882 = vmatprep.subr.bf16.mxu1 %v5540_v55  ;;  %v143_v53 = vld [vmem:[#allocation2 + $0xe0] sm:$0xff]  ;;  %v177_v57 = vpack.c.bf16 %v145_v54, %v145_v54 }
 0x221   :  { %v175_v55 = vpack.c.bf16 %v143_v53, %v143_v53 }
 0x222   :  { %3842 = vmatpush1.bf16.msra.mxu0 %v5535_v36 }
 0x223   :  { %3883 = vmatpush1.bf16.msra.mxu1 %v5538_v62  ;;  %3843 = vmatprep.subr.bf16.mxu0 %v5543_v2 }
 0x224   :  { %3884 = vmatprep.subr.bf16.mxu1 %v5546_v3 }
 0x226   :  { %3844 = vmatpush1.bf16.msra.mxu0 %v5541_v4 }
 0x227   :  { %3885 = vmatpush1.bf16.msra.mxu1 %v5544_v40  ;;  %3845 = vmatprep.subr.bf16.mxu0 %v5549_v5 }
 0x228   :  { %3886 = vmatprep.subr.bf16.mxu1 %v5552_v6 }
 0x22a   :  { %3846 = vmatpush1.bf16.msra.mxu0 %v5547_v7  ;;  %v5619_v7 = vld [vmem:[#allocation8 + $0x78] sm:$0xff]  }
 0x22b   :  { %3887 = vmatpush1.bf16.msra.mxu1 %v5550_v8  ;;  %3847 = vmatprep.subr.bf16.mxu0 %v5555_v9  ;;  %v5620_v8 = vld [vmem:[#allocation8 + $0x38] sm:$0xff]   ;;  %v5621_v9 = vld [vmem:[#allocation8 + $0x70] sm:$0xff]  }
 0x22c   :  { %3888 = vmatprep.subr.bf16.mxu1 %v5558_v10  ;;  %v5622_v10 = vld [vmem:[#allocation8 + $0x30] sm:$0xff]  }
 0x22e   :  { %3848 = vmatpush1.bf16.msra.mxu0 %v5553_v11  ;;  %v5623_v11 = vld [vmem:[#allocation8 + $0x68] sm:$0xff]  }
 0x22f   :  { %3889 = vmatpush1.bf16.msra.mxu1 %v5556_v12  ;;  %3849 = vmatprep.subr.bf16.mxu0 %v5561_v13  ;;  %v5625_v12 = vld [vmem:[#allocation8 + $0x60] sm:$0xff]  }
 0x230   :  { %3890 = vmatprep.subr.bf16.mxu1 %v5564_v14  ;;  %v5626_v13 = vld [vmem:[#allocation8 + $0x20] sm:$0xff]   ;;  %v5628_v14 = vld [vmem:[#allocation8 + $0x18] sm:$0xff]  }
 0x232   :  { %3850 = vmatpush1.bf16.msra.mxu0 %v5559_v15  ;;  %v5629_v15 = vld [vmem:[#allocation8 + $0x50] sm:$0xff]  }
 0x233   :  { %3891 = vmatpush1.bf16.msra.mxu1 %v5562_v17  ;;  %3851 = vmatprep.subr.bf16.mxu0 %v5567_v18  ;;  %v5630_v17 = vld [vmem:[#allocation8 + $0x10] sm:$0xff]  }
 0x234   :  { %3892 = vmatprep.subr.bf16.mxu1 %v5570_v19 }
 0x236   :  { %3852 = vmatpush1.bf16.msra.mxu0 %v5565_v20 }
 0x237   :  { %3893 = vmatpush1.bf16.msra.mxu1 %v5568_v21  ;;  %3853 = vmatprep.subr.bf16.mxu0 %v5573_v58 }
 0x238   :  { %3894 = vmatprep.subr.bf16.mxu1 %v5576_v23  ;;  %v5631_v23 = vld [vmem:[#allocation8 + $0x48] sm:$0xff]  }
 0x23a   :  { %3854 = vmatpush2.bf16.msra.mxu0 %v5571_v24 }
 0x23b   :  { %3895 = vmatpush2.bf16.msra.mxu1 %v5574_v25  ;;  %3855 = vmatprep.subr.bf16.mxu0 %v5579_v26  ;;  %v5632_v26 = vld [vmem:[#allocation8 + $0x8] sm:$0xff]  }
 0x23c   :  { %3896 = vmatprep.subr.bf16.mxu1 %v5582_v63 }
 0x23e   :  { %3856 = vmatpush2.bf16.msra.mxu0 %v5577_v27 }
 0x23f   :  { %3897 = vmatpush2.bf16.msra.mxu1 %v5580_v28  ;;  %3857 = vmatprep.subr.bf16.mxu0 %v5585_v29 }
 0x240   :  { %3898 = vmatprep.subr.bf16.mxu1 %v5588_v30 }
 0x242   :  { %3858 = vmatpush2.bf16.msra.mxu0 %v5583_v31  ;;  %v5633_v31 = vld [vmem:[#allocation8 + $0x40] sm:$0xff]  }
 0x243   :  { %3899 = vmatpush2.bf16.msra.mxu1 %v5586_v32  ;;  %3859 = vmatprep.subr.bf16.mxu0 %v5591_v33  ;;  %v5634_v32 = vld [vmem:[#allocation8] sm:$0xff]  }
 0x244   :  { %3900 = vmatprep.subr.bf16.mxu1 %v5594_v34  ;;  %v5635_v33 = vld [vmem:[#allocation11 + $0x38] sm:$0xff]   ;;  %v5828_v34 = vmov 0.0  }
 0x246   :  { %3860 = vmatpush2.bf16.msra.mxu0 %v5589_v35  ;;  %v5636_v35 = vld [vmem:[#allocation11 + $0x30] sm:$0xff]  }
 0x247   :  { %3901 = vmatpush2.bf16.msra.mxu1 %v5592_v37  ;;  %3861 = vmatprep.subr.bf16.mxu0 %v5597_v38  ;;  %v5637_v37 = vld [vmem:[#allocation11 + $0x28] sm:$0xff]   ;;  %v5638_v38 = vld [vmem:[#allocation11 + $0x20] sm:$0xff]  }
 0x248   :  { %3902 = vmatprep.subr.bf16.mxu1 %v5600_v39  ;;  %v5639_v39 = vld [vmem:[#allocation11 + $0x18] sm:$0xff]  }
 0x24a   :  { %3862 = vmatpush2.bf16.msra.mxu0 %v5595_v16 }
 0x24b   :  { %3903 = vmatpush2.bf16.msra.mxu1 %v5598_v41  ;;  %3863 = vmatprep.subr.bf16.mxu0 %v5603_v42 }
 0x24c   :  { %3904 = vmatprep.subr.bf16.mxu1 %v5606_v43 }
 0x24e   :  { %3864 = vmatpush2.bf16.msra.mxu0 %v5601_v44 }
 0x24f   :  { %3905 = vmatpush2.bf16.msra.mxu1 %v5604_v45  ;;  %3865 = vmatprep.subr.bf16.mxu0 %v5609_v46 }
 0x250   :  { %3906 = vmatprep.subr.bf16.mxu1 %v5612_v22 }
 0x252   :  { %3866 = vmatpush2.bf16.msra.mxu0 %v5607_v47 }
 0x253   :  { %3907 = vmatpush2.bf16.msra.mxu1 %v5610_v48  ;;  %3867 = vmatprep.subr.bf16.mxu0 %v5615_v49 }
 0x254   :  { %3908 = vmatprep.subr.bf16.mxu1 %v5618_v50 }
 0x256   :  { %3868 = vmatpush2.bf16.msra.mxu0 %v5613_v51 }
 0x257   :  { %3909 = vmatpush2.bf16.msra.mxu1 %v5616_v52  ;;  %4786 = vmatprep.subr.bf16.mxu0 %v5619_v7  ;;  %v5642_v7 = vld [vmem:[#allocation11] sm:$0xff]  }
 0x258   :  { %4817 = vmatprep.subr.bf16.mxu1 %v5828_v34 }
 0x259   :  { %v3625_v59 = vpop.f32.mrf.mxu0  ;;  %3870 = vmatmul.mubr.bf16.vlgmr.msra.gmra.mxu0 %v175_v55 }
 0x25a   :  { %v3666_v60 = vpop.f32.mrf.mxu1  ;;  %3911 = vmatmul.mubr.bf16.vlgmr.msra.gmra.mxu1 %v177_v57  ;;  %v3626_v36 = vadd.f32 %v3625_v59, %v5909_v56  ;;  %4787 = vmatpush3.bf16.msra.mxu0 %v5620_v8  ;;  %v5624_v56 = vld [vmem:[#allocation8 + $0x28] sm:$0xff]  }
 0x25b   :  { %v3627_v62 = vpop.f32.mrf.mxu0  ;;  %4788 = vmatprep.subr.bf16.mxu0 %v5621_v9  ;;  %4818 = vmatpush3.bf16.msra.mxu1 %v5635_v33  ;;  %v4760_v9 = vld [vmem:[#allocation10] ss:$0 sm:$0xff] }
 0x25c   :  { %v3668_v0 = vpop.f32.mrf.mxu1  ;;  %v3667_v1 = vadd.f32 %v3666_v60, %v3626_v36  ;;  %v3628_v2 = vadd.f32 %v3627_v62, %v5912_v61  ;;  %v5627_v61 = vld [vmem:[#allocation8 + $0x58] sm:$0xff]   ;;  %4819 = vmatprep.subr.bf16.mxu1 %v5828_v34  ;;  %4833 = vmatprep.mubr.msk.bf16.mxu1 %vm5829_vm0, %v5828_v34 }
 0x25d   :  { %v3629_v3 = vpop.f32.mrf.mxu0 }
 0x25e   :  { %v3670_v4 = vpop.f32.mrf.mxu1  ;;  %v3669_v40 = vadd.f32 %v3668_v0, %v3628_v2  ;;  %4789 = vmatpush3.bf16.msra.mxu0 %v5622_v10 }
 0x25f   :  { %v3630_v5 = vpop.f32.mrf.mxu0  ;;  %4790 = vmatprep.subr.bf16.mxu0 %v5623_v11  ;;  %4820 = vmatpush3.bf16.msra.mxu1 %v5636_v35 }
 0x260   :  { %v3671_v6 = vpop.f32.mrf.mxu1  ;;  %4821 = vmatprep.subr.bf16.mxu1 %v5828_v34  ;;  %v5640_v5 = vld [vmem:[#allocation11 + $0x10] sm:$0xff]  }
 0x261   :  { %v5641_v6 = vld [vmem:[#allocation11 + $0x8] sm:$0xff]  }
 0x262   :  { %4791 = vmatpush3.bf16.msra.mxu0 %v5624_v56 }
 0x263   :  { %4792 = vmatprep.subr.bf16.mxu0 %v5625_v12  ;;  %4822 = vmatpush3.bf16.msra.mxu1 %v5637_v37 }
 0x264   :  { %4823 = vmatprep.subr.bf16.mxu1 %v5828_v34 }
 0x266   :  { %4793 = vmatpush3.bf16.msra.mxu0 %v5626_v13 }
 0x267   :  { %4794 = vmatprep.subr.bf16.mxu0 %v5627_v61  ;;  %4824 = vmatpush3.bf16.msra.mxu1 %v5638_v38 }
 0x268   :  { %4825 = vmatprep.subr.bf16.mxu1 %v5828_v34 }
 0x26a   :  { %4795 = vmatpush3.bf16.msra.mxu0 %v5628_v14 }
 0x26b   :  { %4796 = vmatprep.subr.bf16.mxu0 %v5629_v15  ;;  %4826 = vmatpush3.bf16.msra.mxu1 %v5639_v39  ;;  %v4777_v15 = vld [vmem:[#allocation13] ss:$0 sm:$0xff] }
 0x26c   :  { %4827 = vmatprep.subr.bf16.mxu1 %v5828_v34 }
 0x26e   :  { %4797 = vmatpush3.bf16.msra.mxu0 %v5630_v17 }
 0x26f   :  { %4798 = vmatprep.subr.bf16.mxu0 %v5631_v23  ;;  %4828 = vmatpush3.bf16.msra.mxu1 %v5640_v5 }
 0x270   :  { %4829 = vmatprep.subr.bf16.mxu1 %v5828_v34 }
 0x272   :  { %4799 = vmatpush3.bf16.msra.mxu0 %v5632_v26 }
 0x273   :  { %4800 = vmatprep.subr.bf16.mxu0 %v5633_v31  ;;  %4830 = vmatpush3.bf16.msra.mxu1 %v5641_v6 }
 0x274   :  { %4831 = vmatprep.subr.bf16.mxu1 %v5828_v34 }
 0x276   :  { %4801 = vmatpush3.bf16.msra.mxu0 %v5634_v32 }
 0x277   :  { %4832 = vmatpush3.bf16.msra.mxu1 %v5642_v7 }
 0x299   :  { %v3707_v18 = vpop.f32.mrf.mxu0 }
 0x29a   :  { %v3748_v19 = vpop.f32.mrf.mxu1  ;;  %v3708_v20 = vadd.f32 %v3707_v18, %v3667_v1 }
 0x29b   :  { %v3709_v21 = vpop.f32.mrf.mxu0 }
 0x29c   :  { %v3750_v58 = vpop.f32.mrf.mxu1  ;;  %v3749_v24 = vadd.f32 %v3748_v19, %v3708_v20  ;;  %v3710_v25 = vadd.f32 %v3709_v21, %v3669_v40 }
 0x29d   :  { %v3711_v63 = vpop.f32.mrf.mxu0 }
 0x29e   :  { %v3752_v27 = vpop.f32.mrf.mxu1  ;;  %v3751_v28 = vadd.f32 %v3750_v58, %v3710_v25 }
 0x29f   :  { %v3712_v29 = vpop.f32.mrf.mxu0 }
 0x2a0   :  { %v3753_v30 = vpop.f32.mrf.mxu1 }
 0x2d9   :  { %v3789_v16 = vpop.f32.mrf.mxu0 }
 0x2da   :  { %v3830_v41 = vpop.f32.mrf.mxu1  ;;  %v3790_v42 = vadd.f32 %v3789_v16, %v3749_v24 }
 0x2db   :  { %v3791_v43 = vpop.f32.mrf.mxu0 }
 0x2dc   :  { %v3832_v44 = vpop.f32.mrf.mxu1  ;;  %v3831_v45 = vadd.f32 %v3830_v41, %v3790_v42  ;;  %v3792_v49 = vadd.f32 %v3791_v43, %v3751_v28 }
 0x2dd   :  { %v3793_v46 = vpop.f32.mrf.mxu0 }
 0x2de   :  { %v3834_v22 = vpop.f32.mrf.mxu1  ;;  %v3833_v52 = vadd.f32 %v3832_v44, %v3792_v49 }
 0x2df   :  { %v3794_v47 = vpop.f32.mrf.mxu0 }
 0x2e0   :  { %v3835_v48 = vpop.f32.mrf.mxu1 }
 0x319   :  { %v3871_v50 = vpop.f32.mrf.mxu0 }
 0x31a   :  { %v3912_v51 = vpop.f32.mrf.mxu1  ;;  %v3872_v53 = vadd.f32 %v3871_v50, %v3831_v45 }
 0x31b   :  { %v3873_v54 = vpop.f32.mrf.mxu0 }
 0x31c   :  { %v3914_v55 = vpop.f32.mrf.mxu1  ;;  %v3913_v57 = vadd.f32 %v3912_v51, %v3872_v53  ;;  %v3874_v59 = vadd.f32 %v3873_v54, %v3833_v52 }
 0x31d   :  { %v3875_v60 = vpop.f32.mrf.mxu0 }
 0x31e   :  { %v3916_v36 = vpop.f32.mrf.mxu1  ;;  %v3915_v62 = vadd.f32 %v3914_v55, %v3874_v59  ;;  %v3919_v0 = vmax.f32 %v3913_v57, 0.0 }
 0x31f   :  { %v3876_v1 = vpop.f32.mrf.mxu0 }
 0x320   :  { %v3917_v2 = vpop.f32.mrf.mxu1  ;;  %v3920_v3 = vmax.f32 %v3915_v62, 0.0  ;;  %v3921_v40 = vpack.c.bf16 %v3919_v0, %v3919_v0 }
 0x322   :  { %v3922_v4 = vpack.c.bf16 %v3920_v3, %v3920_v3 }
 0x324   :  { %4090 = vmatprep.mubr.bf16.mxu0 %v3922_v4 }
 0x325   :  { %4091 = vmatmul.mubr.bf16.vlgmr.msra.gmra.mxu0 %v3921_v40 }
 0x3e5   :  { %v4802_v8 = vpop.f32.mrf.mxu0 }
 0x3e7   :  { %v4803_v10 = vpop.f32.mrf.mxu0 }
 0x3e8   :  { %v4804_v11 = vadd.f32 %v4803_v10, %v4802_v8 }
 0x3e9   :  { %v4805_v56 = vpop.f32.mrf.mxu0 }
 0x3ea   :  { %v4093_v12 = vadd.f32 %v4804_v11, %v4760_v9 }
 0x3eb   :  { %v4806_v13 = vpop.f32.mrf.mxu0 }
 0x3ec   :  { %v4098_v61 = vmax.f32 %v4093_v12, 0.0 }
 0x3ee   :  { %v4099_v14 = vpack.c.bf16 %v4098_v61, %v4098_v61 }
 0x3f0   :  { %4834 = vmatmul.mubr.bf16.vlgmr.msra.gmra.mxu1 %v4099_v14 }
 0x4b0   :  { %v4205_v17 = vpop.f32.mrf.mxu1 }
 0x4b1   :  { %v4206_v18 = vadd.f32 %v4777_v15, %v4205_v17 }
 0x4b2   :  { %v4835_v19 = vpop.f32.mrf.mxu1 }
 0x4b3   :  { %v4211_v20 = vrot.slane %v4206_v18, 4 }
 0x4b4   :  { %v4208_v21 = vpop.f32.mrf.mxu1 }
 0x4b5   :  { %v4212_v58 = vmax.f32 %v4206_v18, %v4211_v20 }
 0x4b6   :  { %v4836_v23 = vpop.f32.mrf.mxu1 }
 0x4b7   :  { %v4213_v24 = vrot.slane %v4212_v58, 2 }
 0x4b9   :  { %v4214_v25 = vmax.f32 %v4212_v58, %v4213_v24 }
 0x4bb   :  { %v4215_v26 = vrot.slane %v4214_v25, 1 }
 0x4bd   :  { %v4216_v63 = vmax.f32 %v4214_v25, %v4215_v26 }
 0x4bf   :  { %v4217_v27 = vsub.f32 %v4206_v18, %v4216_v63 }
 0x4c1   :  { %v4218_v28 = vmul.f32 1.442695, %v4217_v27 }
 0x4c3   :  { %5643 = vpow2.f32 %v4218_v28 }
 0x4d0   :  { %v5644_v29 = vpop.eup %5643 }
 0x4d1   :  { %v4220_v30 = vrot.slane %v5644_v29, 4 }
 0x4d3   :  { %v4221_v31 = vadd.f32 %v5644_v29, %v4220_v30 }
 0x4d5   :  { %v4222_v32 = vrot.slane %v4221_v31, 2 }
 0x4d7   :  { %v4223_v33 = vadd.f32 %v4222_v32, %v4221_v31 }
 0x4d9   :  { %v4224_v34 = vrot.slane %v4223_v33, 1 }
 0x4db   :  { %v4225_v35 = vadd.f32 %v4224_v34, %v4223_v33 }
 0x4dd   :  { %5645 = vlog2.f32 %v4225_v35 }
 0x4ea   :  { %v5646_v37 = vpop.eup %5645 }
 0x4eb   :  { %v4227_v38 = vmul.f32 0.6931472, %v5646_v37 }
 0x4ed   :  { %v4228_v39 = vsub.f32 %v4217_v27, %v4227_v38 }
 0x4ef   :  { %4229 = vst [vmem:[#allocation14] sm:$0xff] %v4228_v39 }
 0x4f0   :  { %5798 = shalt.err (!%p5795_p11)
}
 0x4f1   :  { %4239 = dma.vmem_to_hbm [thread:$0]  %s4237_s6, 128, %s5926_s7, [#allocation4]  }
 0x4f2   :  { %5815 = dma.done.wait [#allocation4], 128  }
 0x4f3   :  { %5816 = vsyncadd [#allocation4], 4294967168 }
 0x4f4   :  { %4243 = vsyncpa [#allocation3], 1 }
 0x4f5   :  { %4244 = vsyncpa [#allocation6], 1 }
 0x4f6   :  { %4245 = vsyncpa [#allocation9], 1 }
 0x4f7   :  { %4246 = vsyncpa [#allocation12], 1 }
 0x4f8   :  { %4247 = vsyncpa [#allocation4], 1 }

</bundles_post_ra>
